<compile_context>
chip_gen: v5e
topology: v5e:2x2
jax: 0.10.0
libtpu: 0.0.40
codegen_flags: <defaults>
</compile_context>

<pallas_src>
import functools

import jax
import jax.numpy as jnp
from jax import lax
from jax.experimental import pallas as pl
from jax.experimental.pallas import tpu as pltpu

EPS = 1e-12


# ---------------- Kernel 1: power iteration -> 1/sigma, u, v ----------------
def _spectral_norm_kernel(w_ref, u_ref, inv_sigma_ref, u_out_ref, v_out_ref,
                          *, power_iterations):
    w = w_ref[...].astype(jnp.float32)       # (Cout, Cin*KH*KW) == W.view(height, -1)
    u = u_ref[...].astype(jnp.float32)       # (1, Cout)
    v = jnp.zeros((1, w.shape[1]), jnp.float32)
    for _ in range(power_iterations):
        # v = l2normalize(W^T u)
        v = jnp.dot(u, w, preferred_element_type=jnp.float32)            # (1, W2d)
        v = v / (jnp.sqrt(jnp.sum(v * v)) + EPS)
        # u = l2normalize(W v)   (contract lane dims, no explicit transpose)
        wv = lax.dot_general(v, w, (((1,), (1,)), ((), ())),
                             preferred_element_type=jnp.float32)          # (1, Cout)
        u = wv / (jnp.sqrt(jnp.sum(wv * wv)) + EPS)
    wv = lax.dot_general(v, w, (((1,), (1,)), ((), ())),
                         preferred_element_type=jnp.float32)              # (1, Cout)
    sigma = jnp.sum(u * wv, axis=1, keepdims=True)                        # (1, 1)
    inv_sigma_ref[...] = 1.0 / sigma
    u_out_ref[...] = u
    v_out_ref[...] = v


# ---------------- Kernel 2: Conv2d with W_bar * (1/sigma) ----------------
def _conv2d_kernel(inv_sigma_ref, xp_ref, w_ref, b_ref, o_ref, patches_ref,
                   *, KH, KW, H_out, W_out):
    # inv_sigma_ref: (1, 1) SMEM scalar = 1/sigma
    # xp_ref : (1, Hp, Wp, Cin)    padded NHWC slab for one image
    # w_ref  : (Cout, KH*KW*Cin)   OHWI-flattened un-normalized weight
    # b_ref  : (Cout, 1)           bias
    # o_ref  : (1, Cout, H_out*W_out)  NCHW output, flattened (lane-dense) spatial
    # patches_ref: (H_out*W_out, KH*KW*Cin) f32 VMEM scratch (im2col matrix)
    cin = xp_ref.shape[3]
    cout = w_ref.shape[0]
    hw = H_out * W_out

    # im2col: column (kh*KW + kw)*Cin + c  <-  x_pad[h+kh, w+kw, c]
    idx = 0
    for r in range(KH):
        for s in range(KW):
            tap = xp_ref[0, r:r + H_out, s:s + W_out, :]        # (H_out, W_out, Cin)
            patches_ref[:, idx * cin:(idx + 1) * cin] = (
                tap.reshape(hw, cin).astype(jnp.float32))
            idx += 1

    # One MXU matmul; spectral scale applied to the (tiny) weight tile.
    w_scaled = w_ref[...].astype(jnp.float32) * inv_sigma_ref[0, 0]       # (Cout, K)
    acc = lax.dot_general(w_scaled, patches_ref[...], (((1,), (1,)), ((), ())),
                          preferred_element_type=jnp.float32)             # (Cout, HW)
    acc = acc + b_ref[...].astype(jnp.float32)                            # (Cout, 1) bcast
    o_ref[...] = acc.reshape(1, cout, hw).astype(o_ref.dtype)


# ---------------- Wrapper ----------------
def spectral_norm_conv2d_forward(x, w_bar, bias, u, *, power_iterations=1,
                                 padding=1):
    """x: (N, Cin, H, W) NCHW.  w_bar: (Cout, Cin, KH, KW) OIHW.  u: (Cout,)."""
    if power_iterations < 1:
        raise ValueError("power_iterations must be >= 1 (as in PyTorch).")
    cout, cin, kh, kw = w_bar.shape
    kdim = cin * kh * kw

    # --- spectral normalization: 1/sigma and updated u, v ---
    w2d = w_bar.reshape(cout, kdim).astype(jnp.float32)   # PyTorch's w.view(h, -1)
    u2d = u.reshape(1, cout).astype(jnp.float32)
    sn_kernel = functools.partial(_spectral_norm_kernel,
                                  power_iterations=power_iterations)
    inv_sigma, u_new, v_new = pl.pallas_call(
        sn_kernel,
        out_shape=(jax.ShapeDtypeStruct((1, 1), jnp.float32),
                   jax.ShapeDtypeStruct((1, cout), jnp.float32),
                   jax.ShapeDtypeStruct((1, kdim), jnp.float32)),
        grid=(1,),
        in_specs=[pl.BlockSpec((cout, kdim), lambda i: (0, 0)),
                  pl.BlockSpec((1, cout), lambda i: (0, 0))],
        out_specs=(pl.BlockSpec((1, 1), lambda i: (0, 0)),
                   pl.BlockSpec((1, cout), lambda i: (0, 0)),
                   pl.BlockSpec((1, kdim), lambda i: (0, 0))),
    )(w2d, u2d)

    # Sigma-independent weight prep (hoisted out of the serial chain):
    # OIHW -> OHWI flat, matching the kernel's im2col column ordering.
    w_mat = jnp.transpose(w_bar, (0, 2, 3, 1)).reshape(cout, kdim)
    b_col = bias.reshape(cout, 1)

    # --- Conv2d forward ---
    n, _, h, w = x.shape
    h_out = h + 2 * padding - kh + 1
    w_out = w + 2 * padding - kw + 1
    hp, wp = h + 2 * padding, w + 2 * padding
    x_nhwc = jnp.transpose(x, (0, 2, 3, 1))
    xp = jnp.pad(x_nhwc, ((0, 0), (padding, padding), (padding, padding), (0, 0)))

    conv_kernel = functools.partial(_conv2d_kernel, KH=kh, KW=kw,
                                    H_out=h_out, W_out=w_out)
    y_flat = pl.pallas_call(
        conv_kernel,
        out_shape=jax.ShapeDtypeStruct((n, cout, h_out * w_out), x.dtype),
        grid=(n,),
        in_specs=[pl.BlockSpec((1, 1), lambda b: (0, 0),
                               memory_space=pltpu.MemorySpace.SMEM),
                  pl.BlockSpec((1, hp, wp, cin), lambda b: (b, 0, 0, 0)),
                  pl.BlockSpec((cout, kdim), lambda b: (0, 0)),
                  pl.BlockSpec((cout, 1), lambda b: (0, 0))],
        out_specs=pl.BlockSpec((1, cout, h_out * w_out), lambda b: (b, 0, 0)),
        scratch_shapes=[pltpu.VMEM((h_out * w_out, kdim), jnp.float32)],
        compiler_params=pltpu.CompilerParams(dimension_semantics=("parallel",)),
    )(inv_sigma, xp, w_mat, b_col)

    # Free trailing reshape back to NCHW (no transpose pass over the output).
    y = y_flat.reshape(n, cout, h_out, w_out)
    return y, u_new.reshape(cout), v_new.reshape(kdim)


# ---------------- Pure-JAX reference for verification ----------------
def _reference(x, w_bar, bias, u, power_iterations=1, padding=1):
    cout = w_bar.shape[0]
    w2d = w_bar.reshape(cout, -1)
    v = None
    for _ in range(power_iterations):
        v = w2d.T @ u
        v = v / (jnp.linalg.norm(v) + EPS)
        u = w2d @ v
        u = u / (jnp.linalg.norm(u) + EPS)
    sigma = u @ (w2d @ v)
    wn = w_bar / sigma
    y = lax.conv_general_dilated(
        x, wn, window_strides=(1, 1),
        padding=((padding, padding), (padding, padding)),
        dimension_numbers=('NCHW', 'OIHW', 'NCHW'))
    return y + bias.reshape(1, cout, 1, 1)


if __name__ == "__main__":
    key = jax.random.PRNGKey(0)
    kx, kw_, kb, ku = jax.random.split(key, 4)

    # SpectralNorm2d(nn.Conv2d(in_channels=4, out_channels=8, kernel_size=3, padding=1))
    N, CIN, H, W = 2, 4, 16, 16
    COUT, KH, KW = 8, 3, 3

    x = jax.random.normal(kx, (N, CIN, H, W), dtype=jnp.float32)
    w_bar = jax.random.normal(kw_, (COUT, CIN, KH, KW), dtype=jnp.float32) * 0.1
    bias = jax.random.normal(kb, (COUT,), dtype=jnp.float32) * 0.05
    u0 = jax.random.normal(ku, (COUT,), dtype=jnp.float32)
    u0 = u0 / (jnp.linalg.norm(u0) + EPS)          # l2normalize(u) at init

    fwd = jax.jit(functools.partial(spectral_norm_conv2d_forward,
                                    power_iterations=1, padding=1))
    y, u_new, v_new = fwd(x, w_bar, bias, u0)
    jax.block_until_ready((y, u_new, v_new))

    y_ref = _reference(x, w_bar, bias, u0, power_iterations=1, padding=1)
    assert y.shape == (N, COUT, H, W)
    assert u_new.shape == (COUT,) and v_new.shape == (CIN * KH * KW,)
    assert jnp.allclose(y, y_ref, atol=1e-3, rtol=1e-3), "mismatch vs reference"

    print("KERNEL_OK")
</pallas_src>

<mosaic_0001>
module attributes {stable_mosaic.version = 11 : i64} {
  func.func @_spectral_norm_kernel(%arg0: i32, %arg1: memref<8x36xf32, #tpu.memory_space<vmem>>, %arg2: memref<1x8xf32, #tpu.memory_space<vmem>>, %arg3: memref<1x1xf32, #tpu.memory_space<vmem>>, %arg4: memref<1x8xf32, #tpu.memory_space<vmem>>, %arg5: memref<1x36xf32, #tpu.memory_space<vmem>>) attributes {dimension_semantics = [#tpu.dimension_semantics<arbitrary>], iteration_bounds = array<i64: 1>, scalar_prefetch = 0 : i64, scratch_operands = 0 : i64, tpu.core_type = #tpu.core_type<tc>, window_params = [{pipeline_mode = #tpu.pipeline_mode<synchronous>, transform_indices = @transform_0, window_bounds = array<i64: 8, 36>}, {pipeline_mode = #tpu.pipeline_mode<synchronous>, transform_indices = @transform_1, window_bounds = array<i64: 1, 8>}, {pipeline_mode = #tpu.pipeline_mode<synchronous>, transform_indices = @transform_2, window_bounds = array<i64: 1, 1>}, {pipeline_mode = #tpu.pipeline_mode<synchronous>, transform_indices = @transform_3, window_bounds = array<i64: 1, 8>}, {pipeline_mode = #tpu.pipeline_mode<synchronous>, transform_indices = @transform_4, window_bounds = array<i64: 1, 36>}]} {
    %c0 = arith.constant 0 : index
    %c0_0 = arith.constant 0 : index
    %0 = vector.load %arg1[%c0, %c0_0] : memref<8x36xf32, #tpu.memory_space<vmem>>, vector<8x36xf32>
    %c0_1 = arith.constant 0 : index
    %c0_2 = arith.constant 0 : index
    %1 = vector.load %arg2[%c0_1, %c0_2] : memref<1x8xf32, #tpu.memory_space<vmem>>, vector<1x8xf32>
    %cst = arith.constant dense<0.000000e+00> : vector<1x36xf32>
    %2 = tpu.matmul %1, %0, %cst {dimension_numbers = #tpu.dot_dimension_numbers<[1], [0], [0], [1], [0, 0, 1, 1], [], []>} : vector<1x8xf32>, vector<8x36xf32>, vector<1x36xf32> -> vector<1x36xf32>
    %3 = arith.mulf %2, %2 : vector<1x36xf32>
    %4 = vector.shape_cast %3 : vector<1x36xf32> to vector<1x1x36xf32>
    %cst_3 = arith.constant dense<0.000000e+00> : vector<1xf32>
    %5 = vector.multi_reduction <add>, %4, %cst_3 [1, 2] : vector<1x1x36xf32> to vector<1xf32>
    %6 = vector.shape_cast %5 : vector<1xf32> to vector<1x1x1xf32>
    %7 = vector.extract %6[0, 0, 0] : f32 from vector<1x1x1xf32>
    %8 = math.sqrt %7 : f32
    %cst_4 = arith.constant 9.99999996E-13 : f32
    %9 = arith.addf %8, %cst_4 : f32
    %10 = vector.broadcast %9 : f32 to vector<1x36xf32>
    %11 = arith.divf %2, %10 : vector<1x36xf32>
    %cst_5 = arith.constant dense<0.000000e+00> : vector<1x8xf32>
    %12 = tpu.matmul %11, %0, %cst_5 {dimension_numbers = #tpu.dot_dimension_numbers<[1], [1], [0], [0], [0, 0, 1, 0], [], []>} : vector<1x36xf32>, vector<8x36xf32>, vector<1x8xf32> -> vector<1x8xf32>
    %13 = arith.mulf %12, %12 : vector<1x8xf32>
    %14 = vector.shape_cast %13 : vector<1x8xf32> to vector<1x1x8xf32>
    %cst_6 = arith.constant dense<0.000000e+00> : vector<1xf32>
    %15 = vector.multi_reduction <add>, %14, %cst_6 [1, 2] : vector<1x1x8xf32> to vector<1xf32>
    %16 = vector.shape_cast %15 : vector<1xf32> to vector<1x1x1xf32>
    %17 = vector.extract %16[0, 0, 0] : f32 from vector<1x1x1xf32>
    %18 = math.sqrt %17 : f32
    %cst_7 = arith.constant 9.99999996E-13 : f32
    %19 = arith.addf %18, %cst_7 : f32
    %20 = vector.broadcast %19 : f32 to vector<1x8xf32>
    %21 = arith.divf %12, %20 : vector<1x8xf32>
    %cst_8 = arith.constant dense<0.000000e+00> : vector<1x8xf32>
    %22 = tpu.matmul %11, %0, %cst_8 {dimension_numbers = #tpu.dot_dimension_numbers<[1], [1], [0], [0], [0, 0, 1, 0], [], []>} : vector<1x36xf32>, vector<8x36xf32>, vector<1x8xf32> -> vector<1x8xf32>
    %23 = arith.mulf %21, %22 : vector<1x8xf32>
    %cst_9 = arith.constant dense<0.000000e+00> : vector<1xf32>
    %24 = vector.multi_reduction <add>, %23, %cst_9 [1] : vector<1x8xf32> to vector<1xf32>
    %25 = vector.shape_cast %24 : vector<1xf32> to vector<1x1xf32>
    %cst_10 = arith.constant 1.000000e+00 : f32
    %26 = vector.broadcast %cst_10 : f32 to vector<1x1xf32>
    %27 = arith.divf %26, %25 : vector<1x1xf32>
    %c0_11 = arith.constant 0 : index
    %c0_12 = arith.constant 0 : index
    %28 = vector.load %arg3[%c0_11, %c0_12] : memref<1x1xf32, #tpu.memory_space<vmem>>, vector<1x1xf32>
    tpu.vector_store %arg3[%c0_11, %c0_12], %27 {strides = array<i32>} : memref<1x1xf32, #tpu.memory_space<vmem>>, vector<1x1xf32>,
    %c0_13 = arith.constant 0 : index
    %c0_14 = arith.constant 0 : index
    %29 = vector.load %arg4[%c0_13, %c0_14] : memref<1x8xf32, #tpu.memory_space<vmem>>, vector<1x8xf32>
    tpu.vector_store %arg4[%c0_13, %c0_14], %21 {strides = array<i32>} : memref<1x8xf32, #tpu.memory_space<vmem>>, vector<1x8xf32>,
    %c0_15 = arith.constant 0 : index
    %c0_16 = arith.constant 0 : index
    %30 = vector.load %arg5[%c0_15, %c0_16] : memref<1x36xf32, #tpu.memory_space<vmem>>, vector<1x36xf32>
    tpu.vector_store %arg5[%c0_15, %c0_16], %11 {strides = array<i32>} : memref<1x36xf32, #tpu.memory_space<vmem>>, vector<1x36xf32>,
    return
  }
  func.func @transform_0(%arg0: i32) -> (i32, i32) {
    %c0_i32 = arith.constant 0 : i32
    %c0_i32_0 = arith.constant 0 : i32
    %c0_i32_1 = arith.constant 0 : i32
    return %c0_i32, %c0_i32_0 : i32, i32
  }
  func.func @transform_1(%arg0: i32) -> (i32, i32) {
    %c0_i32 = arith.constant 0 : i32
    %c0_i32_0 = arith.constant 0 : i32
    %c0_i32_1 = arith.constant 0 : i32
    return %c0_i32, %c0_i32_0 : i32, i32
  }
  func.func @transform_2(%arg0: i32) -> (i32, i32) {
    %c0_i32 = arith.constant 0 : i32
    %c0_i32_0 = arith.constant 0 : i32
    %c0_i32_1 = arith.constant 0 : i32
    return %c0_i32, %c0_i32_0 : i32, i32
  }
  func.func @transform_3(%arg0: i32) -> (i32, i32) {
    %c0_i32 = arith.constant 0 : i32
    %c0_i32_0 = arith.constant 0 : i32
    %c0_i32_1 = arith.constant 0 : i32
    return %c0_i32, %c0_i32_0 : i32, i32
  }
  func.func @transform_4(%arg0: i32) -> (i32, i32) {
    %c0_i32 = arith.constant 0 : i32
    %c0_i32_0 = arith.constant 0 : i32
    %c0_i32_1 = arith.constant 0 : i32
    return %c0_i32, %c0_i32_0 : i32, i32
  }
}

module attributes {stable_mosaic.version = 11 : i64} {
  func.func @_conv2d_kernel(%arg0: i32, %arg1: memref<1x1xf32, #tpu.memory_space<smem>>, %arg2: memref<1x18x18x4xf32, #tpu.memory_space<vmem>>, %arg3: memref<8x36xf32, #tpu.memory_space<vmem>>, %arg4: memref<8x1xf32, #tpu.memory_space<vmem>>, %arg5: memref<1x8x256xf32, #tpu.memory_space<vmem>>, %arg6: memref<256x36xf32, #tpu.memory_space<vmem>>) attributes {dimension_semantics = [#tpu.dimension_semantics<parallel>], iteration_bounds = array<i64: 2>, scalar_prefetch = 0 : i64, scratch_operands = 1 : i64, tpu.core_type = #tpu.core_type<tc>, window_params = [{transform_indices = @transform_0, window_bounds = array<i64: 1, 1>}, {transform_indices = @transform_1, window_bounds = array<i64: 1, 18, 18, 4>}, {pipeline_mode = #tpu.pipeline_mode<synchronous>, transform_indices = @transform_2, window_bounds = array<i64: 8, 36>}, {pipeline_mode = #tpu.pipeline_mode<synchronous>, transform_indices = @transform_3, window_bounds = array<i64: 8, 1>}, {transform_indices = @transform_4, window_bounds = array<i64: 1, 8, 256>}]} {
    %c0 = arith.constant 0 : index
    %c0_0 = arith.constant 0 : index
    %c0_1 = arith.constant 0 : index
    %c0_2 = arith.constant 0 : index
    %0 = vector.load %arg2[%c0, %c0_0, %c0_1, %c0_2] : memref<1x18x18x4xf32, #tpu.memory_space<vmem>>, vector<1x16x16x4xf32>
    %1 = vector.shape_cast %0 : vector<1x16x16x4xf32> to vector<16x16x4xf32>
    %2 = vector.shape_cast %1 : vector<16x16x4xf32> to vector<256x4xf32>
    %c0_3 = arith.constant 0 : index
    %c0_4 = arith.constant 0 : index
    %3 = vector.load %arg6[%c0_3, %c0_4] : memref<256x36xf32, #tpu.memory_space<vmem>>, vector<256x4xf32>
    tpu.vector_store %arg6[%c0_3, %c0_4], %2 {strides = array<i32>} : memref<256x36xf32, #tpu.memory_space<vmem>>, vector<256x4xf32>,
    %c0_5 = arith.constant 0 : index
    %c0_6 = arith.constant 0 : index
    %c1 = arith.constant 1 : index
    %c0_7 = arith.constant 0 : index
    %4 = vector.load %arg2[%c0_5, %c0_6, %c1, %c0_7] : memref<1x18x18x4xf32, #tpu.memory_space<vmem>>, vector<1x16x16x4xf32>
    %5 = vector.shape_cast %4 : vector<1x16x16x4xf32> to vector<16x16x4xf32>
    %6 = vector.shape_cast %5 : vector<16x16x4xf32> to vector<256x4xf32>
    %c0_8 = arith.constant 0 : index
    %c4 = arith.constant 4 : index
    %7 = vector.load %arg6[%c0_8, %c4] : memref<256x36xf32, #tpu.memory_space<vmem>>, vector<256x4xf32>
    tpu.vector_store %arg6[%c0_8, %c4], %6 {strides = array<i32>} : memref<256x36xf32, #tpu.memory_space<vmem>>, vector<256x4xf32>,
    %c0_9 = arith.constant 0 : index
    %c0_10 = arith.constant 0 : index
    %c2 = arith.constant 2 : index
    %c0_11 = arith.constant 0 : index
    %8 = vector.load %arg2[%c0_9, %c0_10, %c2, %c0_11] : memref<1x18x18x4xf32, #tpu.memory_space<vmem>>, vector<1x16x16x4xf32>
    %9 = vector.shape_cast %8 : vector<1x16x16x4xf32> to vector<16x16x4xf32>
    %10 = vector.shape_cast %9 : vector<16x16x4xf32> to vector<256x4xf32>
    %c0_12 = arith.constant 0 : index
    %c8 = arith.constant 8 : index
    %11 = vector.load %arg6[%c0_12, %c8] : memref<256x36xf32, #tpu.memory_space<vmem>>, vector<256x4xf32>
    tpu.vector_store %arg6[%c0_12, %c8], %10 {strides = array<i32>} : memref<256x36xf32, #tpu.memory_space<vmem>>, vector<256x4xf32>,
    %c0_13 = arith.constant 0 : index
    %c1_14 = arith.constant 1 : index
    %c0_15 = arith.constant 0 : index
    %c0_16 = arith.constant 0 : index
    %12 = vector.load %arg2[%c0_13, %c1_14, %c0_15, %c0_16] : memref<1x18x18x4xf32, #tpu.memory_space<vmem>>, vector<1x16x16x4xf32>
    %13 = vector.shape_cast %12 : vector<1x16x16x4xf32> to vector<16x16x4xf32>
    %14 = vector.shape_cast %13 : vector<16x16x4xf32> to vector<256x4xf32>
    %c0_17 = arith.constant 0 : index
    %c12 = arith.constant 12 : index
    %15 = vector.load %arg6[%c0_17, %c12] : memref<256x36xf32, #tpu.memory_space<vmem>>, vector<256x4xf32>
    tpu.vector_store %arg6[%c0_17, %c12], %14 {strides = array<i32>} : memref<256x36xf32, #tpu.memory_space<vmem>>, vector<256x4xf32>,
    %c0_18 = arith.constant 0 : index
    %c1_19 = arith.constant 1 : index
    %c1_20 = arith.constant 1 : index
    %c0_21 = arith.constant 0 : index
    %16 = vector.load %arg2[%c0_18, %c1_19, %c1_20, %c0_21] : memref<1x18x18x4xf32, #tpu.memory_space<vmem>>, vector<1x16x16x4xf32>
    %17 = vector.shape_cast %16 : vector<1x16x16x4xf32> to vector<16x16x4xf32>
    %18 = vector.shape_cast %17 : vector<16x16x4xf32> to vector<256x4xf32>
    %c0_22 = arith.constant 0 : index
    %c16 = arith.constant 16 : index
    %19 = vector.load %arg6[%c0_22, %c16] : memref<256x36xf32, #tpu.memory_space<vmem>>, vector<256x4xf32>
    tpu.vector_store %arg6[%c0_22, %c16], %18 {strides = array<i32>} : memref<256x36xf32, #tpu.memory_space<vmem>>, vector<256x4xf32>,
    %c0_23 = arith.constant 0 : index
    %c1_24 = arith.constant 1 : index
    %c2_25 = arith.constant 2 : index
    %c0_26 = arith.constant 0 : index
    %20 = vector.load %arg2[%c0_23, %c1_24, %c2_25, %c0_26] : memref<1x18x18x4xf32, #tpu.memory_space<vmem>>, vector<1x16x16x4xf32>
    %21 = vector.shape_cast %20 : vector<1x16x16x4xf32> to vector<16x16x4xf32>
    %22 = vector.shape_cast %21 : vector<16x16x4xf32> to vector<256x4xf32>
    %c0_27 = arith.constant 0 : index
    %c20 = arith.constant 20 : index
    %23 = vector.load %arg6[%c0_27, %c20] : memref<256x36xf32, #tpu.memory_space<vmem>>, vector<256x4xf32>
    tpu.vector_store %arg6[%c0_27, %c20], %22 {strides = array<i32>} : memref<256x36xf32, #tpu.memory_space<vmem>>, vector<256x4xf32>,
    %c0_28 = arith.constant 0 : index
    %c2_29 = arith.constant 2 : index
    %c0_30 = arith.constant 0 : index
    %c0_31 = arith.constant 0 : index
    %24 = vector.load %arg2[%c0_28, %c2_29, %c0_30, %c0_31] : memref<1x18x18x4xf32, #tpu.memory_space<vmem>>, vector<1x16x16x4xf32>
    %25 = vector.shape_cast %24 : vector<1x16x16x4xf32> to vector<16x16x4xf32>
    %26 = vector.shape_cast %25 : vector<16x16x4xf32> to vector<256x4xf32>
    %c0_32 = arith.constant 0 : index
    %c24 = arith.constant 24 : index
    %27 = vector.load %arg6[%c0_32, %c24] : memref<256x36xf32, #tpu.memory_space<vmem>>, vector<256x4xf32>
    tpu.vector_store %arg6[%c0_32, %c24], %26 {strides = array<i32>} : memref<256x36xf32, #tpu.memory_space<vmem>>, vector<256x4xf32>,
    %c0_33 = arith.constant 0 : index
    %c2_34 = arith.constant 2 : index
    %c1_35 = arith.constant 1 : index
    %c0_36 = arith.constant 0 : index
    %28 = vector.load %arg2[%c0_33, %c2_34, %c1_35, %c0_36] : memref<1x18x18x4xf32, #tpu.memory_space<vmem>>, vector<1x16x16x4xf32>
    %29 = vector.shape_cast %28 : vector<1x16x16x4xf32> to vector<16x16x4xf32>
    %30 = vector.shape_cast %29 : vector<16x16x4xf32> to vector<256x4xf32>
    %c0_37 = arith.constant 0 : index
    %c28 = arith.constant 28 : index
    %31 = vector.load %arg6[%c0_37, %c28] : memref<256x36xf32, #tpu.memory_space<vmem>>, vector<256x4xf32>
    tpu.vector_store %arg6[%c0_37, %c28], %30 {strides = array<i32>} : memref<256x36xf32, #tpu.memory_space<vmem>>, vector<256x4xf32>,
    %c0_38 = arith.constant 0 : index
    %c2_39 = arith.constant 2 : index
    %c2_40 = arith.constant 2 : index
    %c0_41 = arith.constant 0 : index
    %32 = vector.load %arg2[%c0_38, %c2_39, %c2_40, %c0_41] : memref<1x18x18x4xf32, #tpu.memory_space<vmem>>, vector<1x16x16x4xf32>
    %33 = vector.shape_cast %32 : vector<1x16x16x4xf32> to vector<16x16x4xf32>
    %34 = vector.shape_cast %33 : vector<16x16x4xf32> to vector<256x4xf32>
    %c0_42 = arith.constant 0 : index
    %c32 = arith.constant 32 : index
    %35 = vector.load %arg6[%c0_42, %c32] : memref<256x36xf32, #tpu.memory_space<vmem>>, vector<256x4xf32>
    tpu.vector_store %arg6[%c0_42, %c32], %34 {strides = array<i32>} : memref<256x36xf32, #tpu.memory_space<vmem>>, vector<256x4xf32>,
    %c0_43 = arith.constant 0 : index
    %c0_44 = arith.constant 0 : index
    %36 = vector.load %arg3[%c0_43, %c0_44] : memref<8x36xf32, #tpu.memory_space<vmem>>, vector<8x36xf32>
    %c0_45 = arith.constant 0 : index
    %c0_46 = arith.constant 0 : index
    %37 = memref.load %arg1[%c0_45, %c0_46] : memref<1x1xf32, #tpu.memory_space<smem>>
    %38 = vector.broadcast %37 : f32 to vector<8x36xf32>
    %39 = arith.mulf %36, %38 : vector<8x36xf32>
    %c0_47 = arith.constant 0 : index
    %c0_48 = arith.constant 0 : index
    %40 = vector.load %arg6[%c0_47, %c0_48] : memref<256x36xf32, #tpu.memory_space<vmem>>, vector<256x36xf32>
    %cst = arith.constant dense<0.000000e+00> : vector<8x256xf32>
    %41 = tpu.matmul %39, %40, %cst {dimension_numbers = #tpu.dot_dimension_numbers<[1], [1], [0], [0], [0, 0, 1, 0], [], []>} : vector<8x36xf32>, vector<256x36xf32>, vector<8x256xf32> -> vector<8x256xf32>
    %c0_49 = arith.constant 0 : index
    %c0_50 = arith.constant 0 : index
    %42 = vector.load %arg4[%c0_49, %c0_50] : memref<8x1xf32, #tpu.memory_space<vmem>>, vector<8x1xf32>
    %43 = vector.broadcast %42 : vector<8x1xf32> to vector<8x256xf32>
    %44 = arith.addf %41, %43 : vector<8x256xf32>
    %45 = vector.shape_cast %44 : vector<8x256xf32> to vector<1x8x256xf32>
    %c0_51 = arith.constant 0 : index
    %c0_52 = arith.constant 0 : index
    %c0_53 = arith.constant 0 : index
    %46 = vector.load %arg5[%c0_51, %c0_52, %c0_53] : memref<1x8x256xf32, #tpu.memory_space<vmem>>, vector<1x8x256xf32>
    tpu.vector_store %arg5[%c0_51, %c0_52, %c0_53], %45 {strides = array<i32>} : memref<1x8x256xf32, #tpu.memory_space<vmem>>, vector<1x8x256xf32>,
    return
  }
  func.func @transform_0(%arg0: i32) -> (i32, i32) {
    %c0_i32 = arith.constant 0 : i32
    %c0_i32_0 = arith.constant 0 : i32
    %c0_i32_1 = arith.constant 0 : i32
    return %c0_i32, %c0_i32_0 : i32, i32
  }
  func.func @transform_1(%arg0: i32) -> (i32, i32, i32, i32) {
    %c0_i32 = arith.constant 0 : i32
    %c0_i32_0 = arith.constant 0 : i32
    %c0_i32_1 = arith.constant 0 : i32
    %c0_i32_2 = arith.constant 0 : i32
    return %arg0, %c0_i32, %c0_i32_0, %c0_i32_1 : i32, i32, i32, i32
  }
  func.func @transform_2(%arg0: i32) -> (i32, i32) {
    %c0_i32 = arith.constant 0 : i32
    %c0_i32_0 = arith.constant 0 : i32
    %c0_i32_1 = arith.constant 0 : i32
    return %c0_i32, %c0_i32_0 : i32, i32
  }
  func.func @transform_3(%arg0: i32) -> (i32, i32) {
    %c0_i32 = arith.constant 0 : i32
    %c0_i32_0 = arith.constant 0 : i32
    %c0_i32_1 = arith.constant 0 : i32
    return %c0_i32, %c0_i32_0 : i32, i32
  }
  func.func @transform_4(%arg0: i32) -> (i32, i32, i32) {
    %c0_i32 = arith.constant 0 : i32
    %c0_i32_0 = arith.constant 0 : i32
    %c0_i32_1 = arith.constant 0 : i32
    return %arg0, %c0_i32, %c0_i32_0 : i32, i32, i32
  }
}

</mosaic_0001>

<bundles_post_ra>
// kernel: spectral_norm_conv2d_forward.2
= control target key start
LH: loop header
LB: loop body
LE: loop exit
PB: predicated region body
PF: predicated region fallthrough
CT: control target
= control target key end

     0   :  { %10 = vsyncpa [#allocation3], 0  ;;  %vm18_vm0 = vcmask 64512   ;;  %s375_s0 = inlined_call_operand.vmem [shape: f32[8,36], index: 0, kind: input, shape index: {}]   ;;  %s376_s1 = inlined_call_operand.vmem [shape: f32[1,8], index: 1, kind: input, shape index: {}]   ;;  %s377_s2 = inlined_call_operand.hbm [shape: f32[1,1], index: 2, kind: output, shape index: {0}]   ;;  %s378_s3 = inlined_call_operand.hbm [shape: f32[1,8], index: 3, kind: output, shape index: {1}]   ;;  %s379_s4 = inlined_call_operand.hbm [shape: f32[1,36], index: 4, kind: output, shape index: {2}]  }
   0x1   :  { %v16_v0 = vld [vmem:[%s375_s0] sm:$0xff] }
   0x2   :  { %v17_v1 = vld [vmem:[%s376_s1] sm:$0x1] }
   0x3   :  { %11 = vsyncpa [#allocation5], 0  ;;  %37 = vmatpush.msra.mxu0 %v16_v0  ;;  %vm43_vm1 = vcmask 286720   ;;  %vm85_vm4 = vcmask 293888   ;;  %vm113_vm9 = vcmask 57344   ;;  %s196_s25 = sshll.u32 %s378_s3, 4  ;;  %s197_s25 = int_to_ptr.hbm [resolvable:$true] %s196_s25 }
   0x4   :  { %225 = vmatmul.msk.f32.vlgmr.msra.gmra.mxu0 %vm18_vm0, %v17_v1  ;;  %226 = vmatpush.xpose.msk.msra.mxu1 %vm85_vm4, %v16_v0  ;;  %s325_s26 = smov [#allocation4]   ;;  %s326_s28 = smov [#allocation6]  }
   0x5   :  { %s194_s27 = sshll.u32 %s325_s26, 4  ;;  %s205_s29 = sshll.u32 %s326_s28, 4  ;;  %s195_s27 = int_to_ptr.vmem [resolvable:$true] %s194_s27  ;;  %s206_s29 = int_to_ptr.vmem [resolvable:$true] %s205_s29 }
   0x6   :  { %s207_s6 = sshll.u32 %s379_s4, 4  ;;  %s327_s3 = smov [#allocation2]   ;;  %s208_s6 = int_to_ptr.hbm [resolvable:$true] %s207_s6 }
   0x7   :  { %s183_s7 = sshll.u32 %s327_s3, 4  ;;  %s185_s10 = sshll.u32 %s377_s2, 4  ;;  %s184_s7 = int_to_ptr.vmem [resolvable:$true] %s183_s7  ;;  %s186_s10 = int_to_ptr.hbm [resolvable:$true] %s185_s10 }
  0x81   :  { %v39_v2 = vpop.f32.mrf.mxu0 }
  0x82   :  { %v42_v3 = vmul.f32 %v39_v2, %v39_v2 }
  0x84   :  { %v44_v4 = vsel %vm43_vm1, %v42_v3, 0.0 }
  0x85   :  { %45 = vadd.xlane.f32.xlu0 %v44_v4 }
  0xf8   :  { %v46_v5 = vpop.xlane.xlu0 %45 }
  0xf9   :  { %v47_v6 = vrot.slane %v46_v5, 4 }
  0xfb   :  { %v48_v7 = vadd.f32 %v47_v6, %v46_v5 }
  0xfd   :  { %v49_v8 = vrot.slane %v48_v7, 2 }
  0xff   :  { %v50_v9 = vadd.f32 %v49_v8, %v48_v7 }
 0x101   :  { %v51_v10 = vrot.slane %v50_v9, 1 }
 0x103   :  { %v52_v11 = vadd.f32 %v51_v10, %v50_v9 }
 0x105   :  { %228 = vpush %v52_v11 }
 0x136   :  { %s229_s0 = spop %228 }
 0x137   :  { %v54_v12 = vstv %s229_s0 }
 0x138   :  { %239 = vrsqrt.f32 %v54_v12  ;;  %vm62_vm2 = vcmp.eq.f32.partialorder %v54_v12, inf  ;;  %v65_v20 = vand.u32 2147483648, %v54_v12  ;;  %vm64_vm3 = vcmp.eq.f32.partialorder %v54_v12, 0.0 }
 0x13e   :  { %v240_v13 = vpop.eup %239 }
 0x13f   :  { %v56_v14 = vmul.f32 %v240_v13, %v54_v12 }
 0x141   :  { %v57_v15 = vmul.f32 %v240_v13, %v56_v14 }
 0x143   :  { %v58_v16 = vmul.f32 0.5, %v57_v15 }
 0x145   :  { %v59_v17 = vsub.f32 1.5, %v58_v16 }
 0x147   :  { %v60_v18 = vmul.f32 %v240_v13, %v59_v17 }
 0x149   :  { %v61_v19 = vmul.f32 %v60_v18, %v54_v12 }
 0x14b   :  { %v63_v21 = vsel %vm62_vm2, %v54_v12, %v61_v19 }
 0x14c   :  { %v66_v22 = vsel %vm64_vm3, %v65_v20, %v63_v21  ;;  %vm174_vm3 = vcmask 0  }
 0x14d   :  { %230 = vpush %v66_v22 }
 0x17e   :  { %s231_s1 = spop %230 }
 0x17f   :  { %s68_s19 = sadd.f32 1e-12, %s231_s1 }
 0x181   :  { %v69_v23 = vstv %s68_s19 }
 0x182   :  { %241 = vrcp.f32 %v69_v23  ;;  %v81_v27 = vand.u32 2147483648, %v69_v23  ;;  %v79_v29 = vand.u32 2147483647, %v69_v23  ;;  %vm75_vm6 = vweird.f32 %v69_v23 }
 0x184   :  { %v82_v31 = vor.u32 1.1754944e-38, %v81_v27  ;;  %vm80_vm8 = vcmp.eq.f32.partialorder %v79_v29, 8.507059e+37 }
 0x188   :  { %v242_v24 = vpop.eup %241 }
 0x189   :  { %v71_v25 = vmul.f32 %v242_v24, %v69_v23  ;;  %vm76_vm5 = vweird.f32 %v242_v24 }
 0x18a   :  { %vm77_vm7 = vmor %vm75_vm6, %vm76_vm5 }
 0x18b   :  { %v72_v26 = vsub.f32 1.0, %v71_v25 }
 0x18d   :  { %v73_v28 = vmul.f32 %v242_v24, %v72_v26 }
 0x18f   :  { %v74_v30 = vadd.f32 %v242_v24, %v73_v28 }
 0x191   :  { %v78_v32 = vsel %vm77_vm7, %v242_v24, %v74_v30 }
 0x192   :  { %v83_v33 = vsel %vm80_vm8, %v82_v31, %v78_v32 }
 0x193   :  { %v84_v34 = vmul.f32 %v83_v33, %v39_v2 }
 0x195   :  { %227 = vmatmul.msk.f32.vlgmr.msra.gmra.mxu1 %vm85_vm4, %v84_v34  ;;  %177 = vst.msk [vmem:[#allocation6] sm:$0x1] %vm43_vm1, %v84_v34 }
 0x212   :  { %v109_v35 = vpop.f32.mrf.mxu1 }
 0x213   :  { %v112_v36 = vmul.f32 %v109_v35, %v109_v35 }
 0x215   :  { %v114_v37 = vsel %vm113_vm9, %v112_v36, 0.0 }
 0x216   :  { %115 = vadd.xlane.f32.xlu0 %v114_v37 }
 0x289   :  { %v116_v38 = vpop.xlane.xlu0 %115 }
 0x28a   :  { %v117_v39 = vrot.slane %v116_v38, 4 }
 0x28c   :  { %v118_v40 = vadd.f32 %v117_v39, %v116_v38 }
 0x28e   :  { %v119_v41 = vrot.slane %v118_v40, 2 }
 0x290   :  { %v120_v42 = vadd.f32 %v119_v41, %v118_v40 }
 0x292   :  { %v121_v43 = vrot.slane %v120_v42, 1 }
 0x294   :  { %v122_v44 = vadd.f32 %v121_v43, %v120_v42 }
 0x296   :  { %232 = vpush %v122_v44 }
 0x2c7   :  { %s233_s20 = spop %232 }
 0x2c8   :  { %v124_v45 = vstv %s233_s20 }
 0x2c9   :  { %243 = vrsqrt.f32 %v124_v45  ;;  %vm132_vm10 = vcmp.eq.f32.partialorder %v124_v45, inf  ;;  %v135_v53 = vand.u32 2147483648, %v124_v45  ;;  %vm134_vm11 = vcmp.eq.f32.partialorder %v124_v45, 0.0 }
 0x2cf   :  { %v244_v46 = vpop.eup %243 }
 0x2d0   :  { %v126_v47 = vmul.f32 %v244_v46, %v124_v45 }
 0x2d2   :  { %v127_v48 = vmul.f32 %v244_v46, %v126_v47 }
 0x2d4   :  { %v128_v49 = vmul.f32 0.5, %v127_v48 }
 0x2d6   :  { %v129_v50 = vsub.f32 1.5, %v128_v49 }
 0x2d8   :  { %v130_v51 = vmul.f32 %v244_v46, %v129_v50 }
 0x2da   :  { %v131_v52 = vmul.f32 %v130_v51, %v124_v45 }
 0x2dc   :  { %v133_v54 = vsel %vm132_vm10, %v124_v45, %v131_v52 }
 0x2dd   :  { %v136_v55 = vsel %vm134_vm11, %v135_v53, %v133_v54 }
 0x2de   :  { %234 = vpush %v136_v55 }
 0x30f   :  { %s235_s21 = spop %234 }
 0x310   :  { %s138_s22 = sadd.f32 1e-12, %s235_s21 }
 0x312   :  { %v139_v56 = vstv %s138_s22 }
 0x313   :  { %245 = vrcp.f32 %v139_v56  ;;  %v151_v60 = vand.u32 2147483648, %v139_v56  ;;  %v149_v62 = vand.u32 2147483647, %v139_v56  ;;  %vm145_vm13 = vweird.f32 %v139_v56 }
 0x315   :  { %v152_v0 = vor.u32 1.1754944e-38, %v151_v60  ;;  %vm150_vm15 = vcmp.eq.f32.partialorder %v149_v62, 8.507059e+37 }
 0x319   :  { %v246_v57 = vpop.eup %245 }
 0x31a   :  { %v141_v58 = vmul.f32 %v246_v57, %v139_v56  ;;  %vm146_vm12 = vweird.f32 %v246_v57 }
 0x31b   :  { %vm147_vm14 = vmor %vm145_vm13, %vm146_vm12 }
 0x31c   :  { %v142_v59 = vsub.f32 1.0, %v141_v58 }
 0x31e   :  { %v143_v61 = vmul.f32 %v246_v57, %v142_v59 }
 0x320   :  { %v144_v63 = vadd.f32 %v246_v57, %v143_v61 }
 0x322   :  { %v148_v1 = vsel %vm147_vm14, %v246_v57, %v144_v63 }
 0x323   :  { %v153_v2 = vsel %vm150_vm15, %v152_v0, %v148_v1 }
 0x324   :  { %v154_v3 = vmul.f32 %v153_v2, %v109_v35 }
 0x326   :  { %v155_v4 = vmul.f32 %v154_v3, %v109_v35  ;;  %176 = vst.msk [vmem:[#allocation4] sm:$0x1] %vm113_vm9, %v154_v3 }
 0x327   :  { %199 = dma.vmem_to_hbm [thread:$0]  %s195_s27, 16, %s197_s25, [#allocation5]  }
 0x328   :  { %v156_v5 = vsel %vm113_vm9, %v155_v4, 0.0  ;;  %210 = dma.vmem_to_hbm [thread:$0]  %s206_s29, 16, %s208_s6, [#allocation5]  }
 0x329   :  { %157 = vadd.xlane.f32.xlu1 %v156_v5 }
 0x39c   :  { %v158_v6 = vpop.xlane.xlu1 %157 }
 0x39d   :  { %247 = vrcp.f32 %v158_v6  ;;  %v170_v10 = vand.u32 2147483648, %v158_v6  ;;  %v168_v12 = vand.u32 2147483647, %v158_v6  ;;  %vm164_vm1 = vweird.f32 %v158_v6 }
 0x39f   :  { %v171_v14 = vor.u32 1.1754944e-38, %v170_v10  ;;  %vm169_vm4 = vcmp.eq.f32.partialorder %v168_v12, 8.507059e+37 }
 0x3a3   :  { %v248_v7 = vpop.eup %247 }
 0x3a4   :  { %v160_v8 = vmul.f32 %v248_v7, %v158_v6  ;;  %vm165_vm0 = vweird.f32 %v248_v7 }
 0x3a5   :  { %vm166_vm2 = vmor %vm164_vm1, %vm165_vm0 }
 0x3a6   :  { %v161_v9 = vsub.f32 1.0, %v160_v8 }
 0x3a8   :  { %v162_v11 = vmul.f32 %v248_v7, %v161_v9 }
 0x3aa   :  { %v163_v13 = vadd.f32 %v248_v7, %v162_v11 }
 0x3ac   :  { %v167_v15 = vsel %vm166_vm2, %v248_v7, %v163_v13 }
 0x3ad   :  { %v172_v16 = vsel %vm169_vm4, %v171_v14, %v167_v15 }
 0x3ae   :  { %175 = vst.msk [vmem:[#allocation2] sm:$0x1] %vm174_vm3, %v172_v16 }
 0x3af   :  { %188 = dma.vmem_to_hbm [thread:$0]  %s184_s7, 16, %s186_s10, [#allocation3]  }
 0x3b0   :  { %321 = dma.done.wait [#allocation3], 16  }
 0x3b1   :  { %322 = vsyncadd [#allocation3], 4294967280 }
 0x3b2   :  { %323 = dma.done.wait [#allocation5], 32  }
 0x3b3   :  { %324 = vsyncadd [#allocation5], 4294967264 }
 0x3b4   :  { %223 = vsyncpa [#allocation3], 1 }
 0x3b5   :  { %224 = vsyncpa [#allocation5], 1 }

// kernel: spectral_norm_conv2d_forward.3
= control target key start
LH: loop header
LB: loop body
LE: loop exit
PB: predicated region body
PF: predicated region fallthrough
CT: control target
= control target key end

     0   :  { %s2351_s17 = smov 0   ;;  %s3534_s0 = inlined_call_operand.<no memory space> [shape: f32[1,1], index: 0, kind: input, shape index: {}]   ;;  %s3535_s1 = inlined_call_operand.vmem [shape: f32[2,18,18,4], index: 1, kind: input, shape index: {}]   ;;  %s3536_s2 = inlined_call_operand.vmem [shape: f32[8,36], index: 2, kind: input, shape index: {}]   ;;  %s3537_s3 = inlined_call_operand.vmem [shape: f32[8,1], index: 3, kind: input, shape index: {}]   ;;  %s3538_s4 = inlined_call_operand.vmem [shape: f32[2,8,256], index: 4, kind: output, shape index: {}]  }
   0x1   :  { %9 = sst [smem:[#allocation3]] %s3534_s0 }
   0x2 LB: > { %s2049_s18 = sadd.s32 4294967295, %s2312_s17   ;;  %p2053_p0 = scmp.ge.s32.totalorder %s2312_s17, 1  ;;  %s2312_s17 = sphi %s2351_s17, %s15_s17  }
   0x3   : > { %p163_p1 = scmp.lt.s32.totalorder %s2312_s17, 3 }
   0x5   : > { %p164_p2 = pnand %p2053_p0, %p163_p1 }
   0x7   : > { %167 = sbr.rel (%p164_p2) target bundleno = 954 (0x3ba), region = 36 }
   0xc   : > { %p189_p3 = scmp.lt.s32.totalorder %s2049_s18, 1  ;;  %s2314_s22 = smov 4   ;;  %vm231_vm0 = vcmask 31744   ;;  %vm424_vm1 = vcmask 64544   ;;  %vm617_vm2 = vcmask 97344   ;;  %vm811_vm3 = vcmask 130144  }
   0xd   : > { %s2315_s23 = smov 8   ;;  %s2316_s24 = smov 12   ;;  %vm1004_vm4 = vcmask 162944   ;;  %vm1197_vm5 = vcmask 195744   ;;  %vm1391_vm6 = vcmask 228544   ;;  %vm1584_vm7 = vcmask 261344  }
   0xe   : > { %s3630_s18 = smov (!%p189_p3, %s2049_s18), 1  ;;  %s2317_s25 = smov 16   ;;  %vm1777_vm8 = vcmask 294144   ;;  %vm1852_vm9 = vcmask 293888  }
   0xf   : > { %s2286_s0 = smul.u32 432, %s3630_s18  ;;  %s2318_s26 = smov 20  }
  0x10   : > { %s2319_s27 = smov 24   ;;  %s2320_s28 = smov 28  }
  0x11   : > { %s2365_s21 = scalar_lea.vmem %s3535_s1, %s2286_s0  ;;  %s2321_s29 = smov 32  }
  0x12   : > { %v264_v0 = vld [vmem:[%s2365_s21 + $0x1] sm:$0xff]  ;;  %v2369_v1 = vld [vmem:[%s2365_s21 + $0x19] sm:$0xff]  ;;  %v2375_v2 = vld [vmem:[%s2365_s21 + $0x31] sm:$0xff]  ;;  %s1811_s6 = sld [smem:[#allocation3]]  ;;  %s2285_s9 = sshll.u32 %s3630_s18, 4 }
  0x13   : > { %328 = vrot.lane.b32.xlu0 %v264_v0, %s2314_s22  ;;  %332 = vrot.lane.b32.xlu1 %v2369_v1, %s2314_s22  ;;  %v265_v3 = vld [vmem:[%s2365_s21 + $0x9] sm:$0xff]  ;;  %v2381_v4 = vld [vmem:[%s2365_s21 + $0x21] sm:$0xff]  ;;  %s198_s12 = scalar_lea.vmem %s3538_s4, %s2285_s9 }
  0x14   : > { %336 = vrot.lane.b32.xlu2 %v2375_v2, %s2314_s22  ;;  %v2387_v5 = vld [vmem:[%s2365_s21 + $0x39] sm:$0xff]  ;;  %v2392_v6 = vld [vmem:[%s2365_s21 + $0x49] sm:$0xff]  ;;  %v2395_v7 = vld [vmem:[%s2365_s21 + $0x51] sm:$0xff] }
  0x15   : > { %v2402_v8 = vld [vmem:[%s2365_s21 + $0x61] sm:$0xff]  ;;  %v2407_v9 = vld [vmem:[%s2365_s21 + $0x69] sm:$0xff]  ;;  %v2410_v10 = vld [vmem:[%s2365_s21 + $0x79] sm:$0xff] }
  0x16   : > { %v2417_v11 = vld [vmem:[%s2365_s21 + $0x81] sm:$0xff]  ;;  %v2422_v12 = vld [vmem:[%s2365_s21 + $0x91] sm:$0xff]  ;;  %v2425_v13 = vld [vmem:[%s2365_s21 + $0x99] sm:$0xff] }
  0x17   : > { %v2432_v14 = vld [vmem:[%s2365_s21 + $0xa9] sm:$0xff]  ;;  %v2437_v15 = vld [vmem:[%s2365_s21 + $0xb1] sm:$0xff]  ;;  %v2440_v16 = vld [vmem:[%s2365_s21 + $0xc1] sm:$0xff] }
  0x18   : > { %v2447_v17 = vld [vmem:[%s2365_s21 + $0xc9] sm:$0xff]  ;;  %v2452_v18 = vld [vmem:[%s2365_s21 + $0xd9] sm:$0xff]  ;;  %v2455_v19 = vld [vmem:[%s2365_s21 + $0xe1] sm:$0xff] }
  0x19   : > { %v2462_v20 = vld [vmem:[%s2365_s21 + $0xf1] sm:$0xff]  ;;  %v2467_v21 = vld [vmem:[%s2365_s21 + $0xf9] sm:$0xff]  ;;  %v2470_v22 = vld [vmem:[%s2365_s21 + $0x109] sm:$0xff] }
  0x1a   : > { %v2477_v23 = vld [vmem:[%s2365_s21 + $0x111] sm:$0xff]  ;;  %v2482_v24 = vld [vmem:[%s2365_s21 + $0x121] sm:$0xff]  ;;  %v2485_v25 = vld [vmem:[%s2365_s21 + $0x129] sm:$0xff] }
  0x1b   : > { %330 = vrot.lane.b32.xlu0 %v265_v3, %s2314_s22  ;;  %334 = vrot.lane.b32.xlu1 %v2381_v4, %s2314_s22  ;;  %v2492_v26 = vld [vmem:[%s2365_s21 + $0x139] sm:$0xff]  ;;  %v2497_v27 = vld [vmem:[%s2365_s21 + $0x141] sm:$0xff] }
  0x1c   : > { %338 = vrot.lane.b32.xlu2 %v2387_v5, %s2314_s22  ;;  %v2500_v28 = vld [vmem:[%s2365_s21 + $0x151] sm:$0xff]  ;;  %v2507_v29 = vld [vmem:[%s2365_s21 + $0x159] sm:$0xff]  ;;  %v2512_v30 = vld [vmem:[%s2365_s21 + $0x169] sm:$0xff] }
  0x1d   : > { %v2515_v31 = vld [vmem:[%s2365_s21 + $0x171] sm:$0xff]  ;;  %v457_v32 = vld [vmem:[%s2365_s21 + $0x2] sm:$0xff]  ;;  %v2527_v35 = vld [vmem:[%s2365_s21 + $0x1a] sm:$0xff] }
  0x1e   : > { %v199_v33 = vld [vmem:[%s2365_s21] sm:$0xff]  ;;  %v458_v34 = vld [vmem:[%s2365_s21 + $0xa] sm:$0xff]  ;;  %3569 = vst [vmem:[#allocation4_spill] sm:$0xff] %v2527_v35  ;;  %v2536_v37 = vld [vmem:[%s2365_s21 + $0x18] sm:$0xff] }
  0x1f   : > { %232 = vst.msk [vmem:[#allocation2] sm:$0xff] %vm231_vm0, %v199_v33  ;;  %v2530_v36 = vld [vmem:[%s2365_s21 + $0x22] sm:$0xff]  ;;  %v2539_v38 = vld [vmem:[%s2365_s21 + $0x30] sm:$0xff]  ;;  %v2553_v41 = vld [vmem:[%s2365_s21 + $0x3a] sm:$0xff] }
  0x20   : > { %3570 = vst [vmem:[#allocation5_spill] sm:$0xff] %v2530_v36  ;;  %v200_v39 = vld [vmem:[%s2365_s21 + $0x8] sm:$0xff]  ;;  %v2550_v40 = vld [vmem:[%s2365_s21 + $0x32] sm:$0xff]  ;;  %v2564_v44 = vld [vmem:[%s2365_s21 + $0x20] sm:$0xff] }
  0x21   : > { %234 = vst.msk [vmem:[#allocation2 + $0x10] sm:$0xff] %vm231_vm0, %v2536_v37  ;;  %v2557_v43 = vld [vmem:[%s2365_s21 + $0x4a] sm:$0xff]  ;;  %v2567_v45 = vld [vmem:[%s2365_s21 + $0x38] sm:$0xff]  ;;  %v2584_v48 = vld [vmem:[%s2365_s21 + $0x62] sm:$0xff] }
  0x22   : > { %236 = vst.msk [vmem:[#allocation2 + $0x20] sm:$0xff] %vm231_vm0, %v2539_v38  ;;  %v2572_v46 = vld [vmem:[%s2365_s21 + $0x48] sm:$0xff]  ;;  %v2581_v47 = vld [vmem:[%s2365_s21 + $0x52] sm:$0xff]  ;;  %v2598_v52 = vld [vmem:[%s2365_s21 + $0x60] sm:$0xff] }
  0x23   : > { %340 = vrot.lane.b32.xlu0 %v2392_v6, %s2314_s22  ;;  %342 = vrot.lane.b32.xlu1 %v2395_v7, %s2314_s22  ;;  %233 = vst.msk [vmem:[#allocation2 + $0x8] sm:$0xff] %vm231_vm0, %v200_v39  ;;  %v2588_v50 = vld [vmem:[%s2365_s21 + $0x6a] sm:$0xff]  ;;  %v2612_v54 = vld [vmem:[%s2365_s21 + $0x7a] sm:$0xff] }
  0x24   : > { %344 = vrot.lane.b32.xlu2 %v2402_v8, %s2314_s22  ;;  %3571 = vst [vmem:[#allocation6_spill] sm:$0xff] %v2550_v40  ;;  %v2595_v51 = vld [vmem:[%s2365_s21 + $0x50] sm:$0xff]  ;;  %v2603_v53 = vld [vmem:[%s2365_s21 + $0x68] sm:$0xff]  ;;  %v2626_v58 = vld [vmem:[%s2365_s21 + $0x78] sm:$0xff] }
  0x25   : > { %3572 = vst [vmem:[#allocation7_spill] sm:$0xff] %v2553_v41  ;;  %v2615_v55 = vld [vmem:[%s2365_s21 + $0x82] sm:$0xff]  ;;  %v2619_v57 = vld [vmem:[%s2365_s21 + $0x92] sm:$0xff]  ;;  %v2643_v63 = vld [vmem:[%s2365_s21 + $0x9a] sm:$0xff] }
  0x26   : > { %3573 = vst [vmem:[#allocation8_spill] sm:$0xff] %v2557_v43  ;;  %v2629_v59 = vld [vmem:[%s2365_s21 + $0x80] sm:$0xff]  ;;  %v2636_v62 = vld [vmem:[%s2365_s21 + $0x90] sm:$0xff]  ;;  %v2659_v33 = vld [vmem:[%s2365_s21 + $0x98] sm:$0xff] }
  0x27   : > { %235 = vst.msk [vmem:[#allocation2 + $0x18] sm:$0xff] %vm231_vm0, %v2564_v44  ;;  %v2646_v0 = vld [vmem:[%s2365_s21 + $0xaa] sm:$0xff] }
  0x28   : > { %237 = vst.msk [vmem:[#allocation2 + $0x28] sm:$0xff] %vm231_vm0, %v2567_v45 }
  0x29   : > { %238 = vst.msk [vmem:[#allocation2 + $0x30] sm:$0xff] %vm231_vm0, %v2572_v46 }
  0x2a   : > { %3574 = vst [vmem:[#allocation9_spill] sm:$0xff] %v2581_v47 }
  0x2b   : > { %346 = vrot.lane.b32.xlu0 %v2407_v9, %s2314_s22  ;;  %348 = vrot.lane.b32.xlu1 %v2410_v10, %s2314_s22  ;;  %3575 = vst [vmem:[#allocation10_spill] sm:$0xff] %v2584_v48 }
  0x2c   : > { %350 = vrot.lane.b32.xlu2 %v2417_v11, %s2314_s22  ;;  %3576 = vst [vmem:[#allocation11_spill] sm:$0xff] %v2588_v50 }
  0x2d   : > { %239 = vst.msk [vmem:[#allocation2 + $0x38] sm:$0xff] %vm231_vm0, %v2595_v51 }
  0x2e   : > { %240 = vst.msk [vmem:[#allocation2 + $0x40] sm:$0xff] %vm231_vm0, %v2598_v52 }
  0x2f   : > { %241 = vst.msk [vmem:[#allocation2 + $0x48] sm:$0xff] %vm231_vm0, %v2603_v53 }
  0x30   : > { %3577 = vst [vmem:[#allocation12_spill] sm:$0xff] %v2612_v54 }
  0x31   : > { %3578 = vst [vmem:[#allocation13_spill] sm:$0xff] %v2615_v55 }
  0x32   : > { %3579 = vst [vmem:[#allocation14_spill] sm:$0xff] %v2619_v57 }
  0x33   : > { %352 = vrot.lane.b32.xlu0 %v2422_v12, %s2314_s22  ;;  %354 = vrot.lane.b32.xlu1 %v2425_v13, %s2314_s22  ;;  %242 = vst.msk [vmem:[#allocation2 + $0x50] sm:$0xff] %vm231_vm0, %v2626_v58 }
  0x34   : > { %356 = vrot.lane.b32.xlu2 %v2432_v14, %s2314_s22  ;;  %243 = vst.msk [vmem:[#allocation2 + $0x58] sm:$0xff] %vm231_vm0, %v2629_v59 }
  0x35   : > { %3580 = vst [vmem:[#allocation15_spill] sm:$0xff] %v2643_v63 }
  0x36   : > { %3581 = vst [vmem:[#allocation16_spill] sm:$0xff] %v2646_v0 }
  0x37   : > { %244 = vst.msk [vmem:[#allocation2 + $0x60] sm:$0xff] %vm231_vm0, %v2636_v62 }
  0x38   : > { %245 = vst.msk [vmem:[#allocation2 + $0x68] sm:$0xff] %vm231_vm0, %v2659_v33 }
  0x3b   : > { %358 = vrot.lane.b32.xlu0 %v2437_v15, %s2314_s22  ;;  %360 = vrot.lane.b32.xlu1 %v2440_v16, %s2314_s22 }
  0x3c   : > { %362 = vrot.lane.b32.xlu2 %v2447_v17, %s2314_s22 }
  0x43   : > { %364 = vrot.lane.b32.xlu0 %v2452_v18, %s2314_s22  ;;  %366 = vrot.lane.b32.xlu1 %v2455_v19, %s2314_s22 }
  0x44   : > { %368 = vrot.lane.b32.xlu2 %v2462_v20, %s2314_s22 }
  0x4b   : > { %370 = vrot.lane.b32.xlu0 %v2467_v21, %s2314_s22  ;;  %372 = vrot.lane.b32.xlu1 %v2470_v22, %s2314_s22 }
  0x4c   : > { %374 = vrot.lane.b32.xlu2 %v2477_v23, %s2314_s22 }
  0x53   : > { %376 = vrot.lane.b32.xlu0 %v2482_v24, %s2314_s22  ;;  %378 = vrot.lane.b32.xlu1 %v2485_v25, %s2314_s22 }
  0x54   : > { %380 = vrot.lane.b32.xlu2 %v2492_v26, %s2314_s22 }
  0x5b   : > { %382 = vrot.lane.b32.xlu0 %v2497_v27, %s2314_s22  ;;  %384 = vrot.lane.b32.xlu1 %v2500_v28, %s2314_s22 }
  0x5c   : > { %386 = vrot.lane.b32.xlu2 %v2507_v29, %s2314_s22 }
  0x63   : > { %388 = vrot.lane.b32.xlu0 %v2512_v30, %s2314_s22  ;;  %390 = vrot.lane.b32.xlu1 %v2515_v31, %s2314_s22 }
  0x64   : > { %521 = vrot.lane.b32.xlu2 %v457_v32, %s2315_s23  ;;  %v2652_v32 = vld [vmem:[%s2365_s21 + $0xb2] sm:$0xff] }
  0x65   : > { %3582 = vst [vmem:[#allocation17_spill] sm:$0xff] %v2652_v32 }
  0x6b   : > { %523 = vrot.lane.b32.xlu0 %v458_v34, %s2315_s23  ;;  %525 = vrot.lane.b32.xlu1 %v2527_v35, %s2315_s23  ;;  %v2662_v34 = vld [vmem:[%s2365_s21 + $0xa8] sm:$0xff] }
  0x6c   : > { %527 = vrot.lane.b32.xlu2 %v2530_v36, %s2315_s23  ;;  %246 = vst.msk [vmem:[#allocation2 + $0x70] sm:$0xff] %vm231_vm0, %v2662_v34  ;;  %v2817_v36 = vld [vmem:[%s2365_s21 + $0x16a] sm:$0xff] }
  0x6d   : > { %3597 = vst [vmem:[#allocation32_spill] sm:$0xff] %v2817_v36 }
  0x6e   : > { %v337_v42 = vpop.permute.xlu2 %336 }
  0x6f   : > { %429 = vst.msk [vmem:[#allocation2 + $0x20] sm:$0xff] %vm424_vm1, %v337_v42 }
  0x73   : > { %529 = vrot.lane.b32.xlu0 %v2550_v40, %s2315_s23  ;;  %531 = vrot.lane.b32.xlu1 %v2553_v41, %s2315_s23  ;;  %v2801_v41 = vld [vmem:[%s2365_s21 + $0x140] sm:$0xff] }
  0x74   : > { %533 = vrot.lane.b32.xlu2 %v2557_v43, %s2315_s23  ;;  %v2784_v43 = vld [vmem:[%s2365_s21 + $0x142] sm:$0xff]  ;;  %259 = vst.msk [vmem:[#allocation2 + $0xd8] sm:$0xff] %vm231_vm0, %v2801_v41 }
  0x75   : > { %3594 = vst [vmem:[#allocation29_spill] sm:$0xff] %v2784_v43 }
  0x76   : > { %v339_v49 = vpop.permute.xlu2 %338 }
  0x77   : > { %430 = vst.msk [vmem:[#allocation2 + $0x28] sm:$0xff] %vm424_vm1, %v339_v49  ;;  %v2669_v49 = vld [vmem:[%s2365_s21 + $0xb0] sm:$0xff] }
  0x78   : > { %247 = vst.msk [vmem:[#allocation2 + $0x78] sm:$0xff] %vm231_vm0, %v2669_v49 }
  0x7b   : > { %535 = vrot.lane.b32.xlu0 %v2581_v47, %s2315_s23  ;;  %537 = vrot.lane.b32.xlu1 %v2584_v48, %s2315_s23  ;;  %v2768_v48 = vld [vmem:[%s2365_s21 + $0x120] sm:$0xff] }
  0x7c   : > { %539 = vrot.lane.b32.xlu2 %v2588_v50, %s2315_s23  ;;  %v2751_v50 = vld [vmem:[%s2365_s21 + $0x122] sm:$0xff]  ;;  %256 = vst.msk [vmem:[#allocation2 + $0xc0] sm:$0xff] %vm231_vm0, %v2768_v48 }
  0x7d   : > { %3591 = vst [vmem:[#allocation26_spill] sm:$0xff] %v2751_v50 }
  0x7e   : > { %v345_v56 = vpop.permute.xlu2 %344 }
  0x7f   : > { %433 = vst.msk [vmem:[#allocation2 + $0x40] sm:$0xff] %vm424_vm1, %v345_v56  ;;  %v2676_v56 = vld [vmem:[%s2365_s21 + $0xc2] sm:$0xff] }
  0x80   : > { %3583 = vst [vmem:[#allocation18_spill] sm:$0xff] %v2676_v56 }
  0x83   : > { %541 = vrot.lane.b32.xlu0 %v2612_v54, %s2315_s23  ;;  %543 = vrot.lane.b32.xlu1 %v2615_v55, %s2315_s23  ;;  %v2735_v55 = vld [vmem:[%s2365_s21 + $0xf8] sm:$0xff] }
  0x84   : > { %545 = vrot.lane.b32.xlu2 %v2619_v57, %s2315_s23  ;;  %v2718_v57 = vld [vmem:[%s2365_s21 + $0xfa] sm:$0xff]  ;;  %253 = vst.msk [vmem:[#allocation2 + $0xa8] sm:$0xff] %vm231_vm0, %v2735_v55 }
  0x85   : > { %v329_v60 = vpop.permute.xlu0 %328  ;;  %v333_v61 = vpop.permute.xlu1 %332  ;;  %3588 = vst [vmem:[#allocation23_spill] sm:$0xff] %v2718_v57 }
  0x86   : > { %425 = vst.msk [vmem:[#allocation2] sm:$0xff] %vm424_vm1, %v329_v60  ;;  %v351_v3 = vpop.permute.xlu2 %350  ;;  %v2679_v60 = vld [vmem:[%s2365_s21 + $0xca] sm:$0xff] }
  0x87   : > { %427 = vst.msk [vmem:[#allocation2 + $0x10] sm:$0xff] %vm424_vm1, %v333_v61 }
  0x88   : > { %436 = vst.msk [vmem:[#allocation2 + $0x58] sm:$0xff] %vm424_vm1, %v351_v3  ;;  %v2685_v3 = vld [vmem:[%s2365_s21 + $0xda] sm:$0xff] }
  0x89   : > { %3584 = vst [vmem:[#allocation19_spill] sm:$0xff] %v2679_v60 }
  0x8a   : > { %3585 = vst [vmem:[#allocation20_spill] sm:$0xff] %v2685_v3 }
  0x8b   : > { %547 = vrot.lane.b32.xlu0 %v2643_v63, %s2315_s23  ;;  %549 = vrot.lane.b32.xlu1 %v2646_v0, %s2315_s23  ;;  %v2702_v0 = vld [vmem:[%s2365_s21 + $0xd8] sm:$0xff] }
  0x8c   : > { %551 = vrot.lane.b32.xlu2 %v2652_v32, %s2315_s23  ;;  %250 = vst.msk [vmem:[#allocation2 + $0x90] sm:$0xff] %vm231_vm0, %v2702_v0 }
  0x8d   : > { %v331_v39 = vpop.permute.xlu0 %330  ;;  %v335_v42 = vpop.permute.xlu1 %334 }
  0x8e   : > { %426 = vst.msk [vmem:[#allocation2 + $0x8] sm:$0xff] %vm424_vm1, %v331_v39  ;;  %v357_v61 = vpop.permute.xlu2 %356  ;;  %v2692_v39 = vld [vmem:[%s2365_s21 + $0xc0] sm:$0xff] }
  0x8f   : > { %428 = vst.msk [vmem:[#allocation2 + $0x18] sm:$0xff] %vm424_vm1, %v335_v42  ;;  %v2695_v42 = vld [vmem:[%s2365_s21 + $0xc8] sm:$0xff] }
  0x90   : > { %439 = vst.msk [vmem:[#allocation2 + $0x70] sm:$0xff] %vm424_vm1, %v357_v61 }
  0x91   : > { %248 = vst.msk [vmem:[#allocation2 + $0x80] sm:$0xff] %vm231_vm0, %v2692_v39 }
  0x92   : > { %249 = vst.msk [vmem:[#allocation2 + $0x88] sm:$0xff] %vm231_vm0, %v2695_v42 }
  0x93   : > { %553 = vrot.lane.b32.xlu0 %v2676_v56, %s2315_s23  ;;  %555 = vrot.lane.b32.xlu1 %v2679_v60, %s2315_s23  ;;  %v2709_v60 = vld [vmem:[%s2365_s21 + $0xe2] sm:$0xff]  ;;  %v2712_v56 = vld [vmem:[%s2365_s21 + $0xf2] sm:$0xff] }
  0x94   : > { %557 = vrot.lane.b32.xlu2 %v2685_v3, %s2315_s23  ;;  %3586 = vst [vmem:[#allocation21_spill] sm:$0xff] %v2709_v60 }
  0x95   : > { %v341_v32 = vpop.permute.xlu0 %340  ;;  %v343_v61 = vpop.permute.xlu1 %342  ;;  %3587 = vst [vmem:[#allocation22_spill] sm:$0xff] %v2712_v56 }
  0x96   : > { %431 = vst.msk [vmem:[#allocation2 + $0x30] sm:$0xff] %vm424_vm1, %v341_v32  ;;  %v363_v63 = vpop.permute.xlu2 %362  ;;  %v2725_v32 = vld [vmem:[%s2365_s21 + $0xe0] sm:$0xff] }
  0x97   : > { %432 = vst.msk [vmem:[#allocation2 + $0x38] sm:$0xff] %vm424_vm1, %v343_v61  ;;  %v2728_v61 = vld [vmem:[%s2365_s21 + $0xf0] sm:$0xff] }
  0x98   : > { %442 = vst.msk [vmem:[#allocation2 + $0x88] sm:$0xff] %vm424_vm1, %v363_v63 }
  0x99   : > { %251 = vst.msk [vmem:[#allocation2 + $0x98] sm:$0xff] %vm231_vm0, %v2725_v32 }
  0x9a   : > { %252 = vst.msk [vmem:[#allocation2 + $0xa0] sm:$0xff] %vm231_vm0, %v2728_v61 }
  0x9b   : > { %559 = vrot.lane.b32.xlu0 %v2709_v60, %s2315_s23  ;;  %561 = vrot.lane.b32.xlu1 %v2712_v56, %s2315_s23  ;;  %v2742_v56 = vld [vmem:[%s2365_s21 + $0x10a] sm:$0xff]  ;;  %v2745_v60 = vld [vmem:[%s2365_s21 + $0x112] sm:$0xff] }
  0x9c   : > { %563 = vrot.lane.b32.xlu2 %v2718_v57, %s2315_s23  ;;  %3589 = vst [vmem:[#allocation24_spill] sm:$0xff] %v2742_v56 }
  0x9d   : > { %v347_v3 = vpop.permute.xlu0 %346  ;;  %v349_v63 = vpop.permute.xlu1 %348  ;;  %3590 = vst [vmem:[#allocation25_spill] sm:$0xff] %v2745_v60 }
  0x9e   : > { %434 = vst.msk [vmem:[#allocation2 + $0x48] sm:$0xff] %vm424_vm1, %v347_v3  ;;  %v369_v54 = vpop.permute.xlu2 %368  ;;  %v2758_v3 = vld [vmem:[%s2365_s21 + $0x108] sm:$0xff] }
  0x9f   : > { %435 = vst.msk [vmem:[#allocation2 + $0x50] sm:$0xff] %vm424_vm1, %v349_v63  ;;  %v2761_v63 = vld [vmem:[%s2365_s21 + $0x110] sm:$0xff] }
  0xa0   : > { %445 = vst.msk [vmem:[#allocation2 + $0xa0] sm:$0xff] %vm424_vm1, %v369_v54 }
  0xa1   : > { %254 = vst.msk [vmem:[#allocation2 + $0xb0] sm:$0xff] %vm231_vm0, %v2758_v3 }
  0xa2   : > { %255 = vst.msk [vmem:[#allocation2 + $0xb8] sm:$0xff] %vm231_vm0, %v2761_v63 }
  0xa3   : > { %565 = vrot.lane.b32.xlu0 %v2742_v56, %s2315_s23  ;;  %567 = vrot.lane.b32.xlu1 %v2745_v60, %s2315_s23  ;;  %v2775_v60 = vld [vmem:[%s2365_s21 + $0x12a] sm:$0xff]  ;;  %v2778_v56 = vld [vmem:[%s2365_s21 + $0x13a] sm:$0xff] }
  0xa4   : > { %569 = vrot.lane.b32.xlu2 %v2751_v50, %s2315_s23  ;;  %3592 = vst [vmem:[#allocation27_spill] sm:$0xff] %v2775_v60 }
  0xa5   : > { %v353_v57 = vpop.permute.xlu0 %352  ;;  %v355_v54 = vpop.permute.xlu1 %354  ;;  %3593 = vst [vmem:[#allocation28_spill] sm:$0xff] %v2778_v56 }
  0xa6   : > { %437 = vst.msk [vmem:[#allocation2 + $0x60] sm:$0xff] %vm424_vm1, %v353_v57  ;;  %v375_v47 = vpop.permute.xlu2 %374  ;;  %v2791_v57 = vld [vmem:[%s2365_s21 + $0x128] sm:$0xff] }
  0xa7   : > { %438 = vst.msk [vmem:[#allocation2 + $0x68] sm:$0xff] %vm424_vm1, %v355_v54  ;;  %v2794_v54 = vld [vmem:[%s2365_s21 + $0x138] sm:$0xff] }
  0xa8   : > { %448 = vst.msk [vmem:[#allocation2 + $0xb8] sm:$0xff] %vm424_vm1, %v375_v47 }
  0xa9   : > { %257 = vst.msk [vmem:[#allocation2 + $0xc8] sm:$0xff] %vm231_vm0, %v2791_v57 }
  0xaa   : > { %258 = vst.msk [vmem:[#allocation2 + $0xd0] sm:$0xff] %vm231_vm0, %v2794_v54 }
  0xab   : > { %571 = vrot.lane.b32.xlu0 %v2775_v60, %s2315_s23  ;;  %573 = vrot.lane.b32.xlu1 %v2778_v56, %s2315_s23  ;;  %v2808_v56 = vld [vmem:[%s2365_s21 + $0x152] sm:$0xff]  ;;  %v2811_v60 = vld [vmem:[%s2365_s21 + $0x15a] sm:$0xff] }
  0xac   : > { %575 = vrot.lane.b32.xlu2 %v2784_v43, %s2315_s23  ;;  %3595 = vst [vmem:[#allocation30_spill] sm:$0xff] %v2808_v56 }
  0xad   : > { %v359_v50 = vpop.permute.xlu0 %358  ;;  %v361_v47 = vpop.permute.xlu1 %360  ;;  %3596 = vst [vmem:[#allocation31_spill] sm:$0xff] %v2811_v60 }
  0xae   : > { %440 = vst.msk [vmem:[#allocation2 + $0x78] sm:$0xff] %vm424_vm1, %v359_v50  ;;  %v381_v40 = vpop.permute.xlu2 %380  ;;  %v2824_v50 = vld [vmem:[%s2365_s21 + $0x150] sm:$0xff] }
  0xaf   : > { %441 = vst.msk [vmem:[#allocation2 + $0x80] sm:$0xff] %vm424_vm1, %v361_v47  ;;  %v2827_v47 = vld [vmem:[%s2365_s21 + $0x158] sm:$0xff] }
  0xb0   : > { %451 = vst.msk [vmem:[#allocation2 + $0xd0] sm:$0xff] %vm424_vm1, %v381_v40  ;;  %v2834_v40 = vld [vmem:[%s2365_s21 + $0x168] sm:$0xff] }
  0xb1   : > { %260 = vst.msk [vmem:[#allocation2 + $0xe0] sm:$0xff] %vm231_vm0, %v2824_v50 }
  0xb2   : > { %261 = vst.msk [vmem:[#allocation2 + $0xe8] sm:$0xff] %vm231_vm0, %v2827_v47 }
  0xb3   : > { %577 = vrot.lane.b32.xlu0 %v2808_v56, %s2315_s23  ;;  %579 = vrot.lane.b32.xlu1 %v2811_v60, %s2315_s23  ;;  %v2841_v60 = vld [vmem:[%s2365_s21 + $0x172] sm:$0xff]  ;;  %262 = vst.msk [vmem:[#allocation2 + $0xf0] sm:$0xff] %vm231_vm0, %v2834_v40 }
  0xb4   : > { %581 = vrot.lane.b32.xlu2 %v2817_v36, %s2315_s23  ;;  %3598 = vst [vmem:[#allocation33_spill] sm:$0xff] %v2841_v60 }
  0xb5   : > { %v365_v43 = vpop.permute.xlu0 %364  ;;  %v367_v35 = vpop.permute.xlu1 %366 }
  0xb6   : > { %443 = vst.msk [vmem:[#allocation2 + $0x90] sm:$0xff] %vm424_vm1, %v365_v43  ;;  %v387_v56 = vpop.permute.xlu2 %386  ;;  %v2851_v43 = vld [vmem:[%s2365_s21 + $0x170] sm:$0xff] }
  0xb7   : > { %444 = vst.msk [vmem:[#allocation2 + $0x98] sm:$0xff] %vm424_vm1, %v367_v35 }
  0xb8   : > { %454 = vst.msk [vmem:[#allocation2 + $0xe8] sm:$0xff] %vm424_vm1, %v387_v56 }
  0xb9   : > { %263 = vst.msk [vmem:[#allocation2 + $0xf8] sm:$0xff] %vm231_vm0, %v2851_v43 }
  0xbb   : > { %583 = vrot.lane.b32.xlu0 %v2841_v60, %s2315_s23  ;;  %715 = vrot.lane.b32.xlu1 %v2536_v37, %s2316_s24 }
  0xbc   : > { %717 = vrot.lane.b32.xlu2 %v2564_v44, %s2316_s24 }
  0xbd   : > { %v371_v35 = vpop.permute.xlu0 %370  ;;  %v373_v36 = vpop.permute.xlu1 %372 }
  0xbe   : > { %446 = vst.msk [vmem:[#allocation2 + $0xa8] sm:$0xff] %vm424_vm1, %v371_v35  ;;  %v522_v56 = vpop.permute.xlu2 %521 }
  0xbf   : > { %447 = vst.msk [vmem:[#allocation2 + $0xb0] sm:$0xff] %vm424_vm1, %v373_v36 }
  0xc0   : > { %618 = vst.msk [vmem:[#allocation2] sm:$0xff] %vm617_vm2, %v522_v56 }
  0xc3   : > { %719 = vrot.lane.b32.xlu0 %v2539_v38, %s2316_s24  ;;  %721 = vrot.lane.b32.xlu1 %v2567_v45, %s2316_s24 }
  0xc4   : > { %723 = vrot.lane.b32.xlu2 %v2572_v46, %s2316_s24 }
  0xc5   : > { %v377_v37 = vpop.permute.xlu0 %376  ;;  %v379_v60 = vpop.permute.xlu1 %378 }
  0xc6   : > { %449 = vst.msk [vmem:[#allocation2 + $0xc0] sm:$0xff] %vm424_vm1, %v377_v37  ;;  %v528_v44 = vpop.permute.xlu2 %527 }
  0xc7   : > { %450 = vst.msk [vmem:[#allocation2 + $0xc8] sm:$0xff] %vm424_vm1, %v379_v60 }
  0xc8   : > { %621 = vst.msk [vmem:[#allocation2 + $0x18] sm:$0xff] %vm617_vm2, %v528_v44 }
  0xcb   : > { %725 = vrot.lane.b32.xlu0 %v2595_v51, %s2316_s24  ;;  %727 = vrot.lane.b32.xlu1 %v2598_v52, %s2316_s24 }
  0xcc   : > { %729 = vrot.lane.b32.xlu2 %v2603_v53, %s2316_s24 }
  0xcd   : > { %v383_v36 = vpop.permute.xlu0 %382  ;;  %v385_v38 = vpop.permute.xlu1 %384 }
  0xce   : > { %452 = vst.msk [vmem:[#allocation2 + $0xd8] sm:$0xff] %vm424_vm1, %v383_v36  ;;  %v534_v45 = vpop.permute.xlu2 %533 }
  0xcf   : > { %453 = vst.msk [vmem:[#allocation2 + $0xe0] sm:$0xff] %vm424_vm1, %v385_v38 }
  0xd0   : > { %624 = vst.msk [vmem:[#allocation2 + $0x30] sm:$0xff] %vm617_vm2, %v534_v45 }
  0xd3   : > { %731 = vrot.lane.b32.xlu0 %v2626_v58, %s2316_s24  ;;  %733 = vrot.lane.b32.xlu1 %v2629_v59, %s2316_s24 }
  0xd4   : > { %735 = vrot.lane.b32.xlu2 %v2636_v62, %s2316_s24 }
  0xd5   : > { %v389_v60 = vpop.permute.xlu0 %388  ;;  %v391_v52 = vpop.permute.xlu1 %390 }
  0xd6   : > { %455 = vst.msk [vmem:[#allocation2 + $0xf0] sm:$0xff] %vm424_vm1, %v389_v60  ;;  %v540_v35 = vpop.permute.xlu2 %539 }
  0xd7   : > { %456 = vst.msk [vmem:[#allocation2 + $0xf8] sm:$0xff] %vm424_vm1, %v391_v52 }
  0xd8   : > { %627 = vst.msk [vmem:[#allocation2 + $0x48] sm:$0xff] %vm617_vm2, %v540_v35 }
  0xdb   : > { %737 = vrot.lane.b32.xlu0 %v2659_v33, %s2316_s24  ;;  %739 = vrot.lane.b32.xlu1 %v2662_v34, %s2316_s24 }
  0xdc   : > { %741 = vrot.lane.b32.xlu2 %v2669_v49, %s2316_s24 }
  0xdd   : > { %v524_v56 = vpop.permute.xlu0 %523  ;;  %v526_v59 = vpop.permute.xlu1 %525 }
  0xde   : > { %619 = vst.msk [vmem:[#allocation2 + $0x8] sm:$0xff] %vm617_vm2, %v524_v56  ;;  %v546_v37 = vpop.permute.xlu2 %545 }
  0xdf   : > { %620 = vst.msk [vmem:[#allocation2 + $0x10] sm:$0xff] %vm617_vm2, %v526_v59 }
  0xe0   : > { %630 = vst.msk [vmem:[#allocation2 + $0x60] sm:$0xff] %vm617_vm2, %v546_v37 }
  0xe3   : > { %743 = vrot.lane.b32.xlu0 %v2692_v39, %s2316_s24  ;;  %745 = vrot.lane.b32.xlu1 %v2695_v42, %s2316_s24 }
  0xe4   : > { %747 = vrot.lane.b32.xlu2 %v2702_v0, %s2316_s24 }
  0xe5   : > { %v530_v44 = vpop.permute.xlu0 %529  ;;  %v532_v34 = vpop.permute.xlu1 %531 }
  0xe6   : > { %622 = vst.msk [vmem:[#allocation2 + $0x20] sm:$0xff] %vm617_vm2, %v530_v44  ;;  %v552_v36 = vpop.permute.xlu2 %551 }
  0xe7   : > { %623 = vst.msk [vmem:[#allocation2 + $0x28] sm:$0xff] %vm617_vm2, %v532_v34  ;;  %v3049_v34 = vld [vmem:[%s2365_s21 + $0x189] sm:$0xff] }
  0xe8   : > { %633 = vst.msk [vmem:[#allocation2 + $0x78] sm:$0xff] %vm617_vm2, %v552_v36 }
  0xeb   : > { %749 = vrot.lane.b32.xlu0 %v2725_v32, %s2316_s24  ;;  %751 = vrot.lane.b32.xlu1 %v2728_v61, %s2316_s24 }
  0xec   : > { %753 = vrot.lane.b32.xlu2 %v2735_v55, %s2316_s24 }
  0xed   : > { %v536_v38 = vpop.permute.xlu0 %535  ;;  %v538_v42 = vpop.permute.xlu1 %537 }
  0xee   : > { %625 = vst.msk [vmem:[#allocation2 + $0x38] sm:$0xff] %vm617_vm2, %v536_v38  ;;  %v558_v45 = vpop.permute.xlu2 %557 }
  0xef   : > { %626 = vst.msk [vmem:[#allocation2 + $0x40] sm:$0xff] %vm617_vm2, %v538_v42  ;;  %v3600_v42 = vld [vmem:[#allocation5_spill] sm:$0xff] }
  0xf0   : > { %636 = vst.msk [vmem:[#allocation2 + $0x90] sm:$0xff] %vm617_vm2, %v558_v45  ;;  %v3601_v45 = vld [vmem:[#allocation6_spill] sm:$0xff] }
  0xf3   : > { %755 = vrot.lane.b32.xlu0 %v2758_v3, %s2316_s24  ;;  %757 = vrot.lane.b32.xlu1 %v2761_v63, %s2316_s24 }
  0xf4   : > { %759 = vrot.lane.b32.xlu2 %v2768_v48, %s2316_s24 }
  0xf5   : > { %v542_v60 = vpop.permute.xlu0 %541  ;;  %v544_v61 = vpop.permute.xlu1 %543 }
  0xf6   : > { %628 = vst.msk [vmem:[#allocation2 + $0x50] sm:$0xff] %vm617_vm2, %v542_v60  ;;  %v564_v52 = vpop.permute.xlu2 %563 }
  0xf7   : > { %629 = vst.msk [vmem:[#allocation2 + $0x58] sm:$0xff] %vm617_vm2, %v544_v61 }
  0xf8   : > { %639 = vst.msk [vmem:[#allocation2 + $0xa8] sm:$0xff] %vm617_vm2, %v564_v52  ;;  %v3602_v52 = vld [vmem:[#allocation7_spill] sm:$0xff] }
  0xfb   : > { %761 = vrot.lane.b32.xlu0 %v2791_v57, %s2316_s24  ;;  %763 = vrot.lane.b32.xlu1 %v2794_v54, %s2316_s24 }
  0xfc   : > { %765 = vrot.lane.b32.xlu2 %v2801_v41, %s2316_s24  ;;  %v2941_v41 = vld [vmem:[%s2365_s21 + $0x180] sm:$0xff] }
  0xfd   : > { %v548_v3 = vpop.permute.xlu0 %547  ;;  %v550_v63 = vpop.permute.xlu1 %549 }
  0xfe   : > { %631 = vst.msk [vmem:[#allocation2 + $0x68] sm:$0xff] %vm617_vm2, %v548_v3  ;;  %v570_v48 = vpop.permute.xlu2 %569 }
  0xff   : > { %632 = vst.msk [vmem:[#allocation2 + $0x70] sm:$0xff] %vm617_vm2, %v550_v63  ;;  %v3603_v63 = vld [vmem:[#allocation8_spill] sm:$0xff] }
 0x100   : > { %642 = vst.msk [vmem:[#allocation2 + $0xc0] sm:$0xff] %vm617_vm2, %v570_v48  ;;  %v3604_v48 = vld [vmem:[#allocation9_spill] sm:$0xff] }
 0x103   : > { %767 = vrot.lane.b32.xlu0 %v2824_v50, %s2316_s24  ;;  %769 = vrot.lane.b32.xlu1 %v2827_v47, %s2316_s24  ;;  %v2949_v50 = vld [vmem:[%s2365_s21 + $0x188] sm:$0xff] }
 0x104   : > { %771 = vrot.lane.b32.xlu2 %v2834_v40, %s2316_s24 }
 0x105   : > { %v554_v57 = vpop.permute.xlu0 %553  ;;  %v556_v54 = vpop.permute.xlu1 %555 }
 0x106   : > { %634 = vst.msk [vmem:[#allocation2 + $0x80] sm:$0xff] %vm617_vm2, %v554_v57  ;;  %v576_v35 = vpop.permute.xlu2 %575 }
 0x107   : > { %635 = vst.msk [vmem:[#allocation2 + $0x88] sm:$0xff] %vm617_vm2, %v556_v54 }
 0x108   : > { %645 = vst.msk [vmem:[#allocation2 + $0xd8] sm:$0xff] %vm617_vm2, %v576_v35  ;;  %v3605_v35 = vld [vmem:[#allocation10_spill] sm:$0xff] }
 0x10b   : > { %773 = vrot.lane.b32.xlu0 %v2851_v43, %s2316_s24  ;;  %775 = vrot.lane.b32.xlu1 %v2941_v41, %s2316_s24 }
 0x10c   : > { %777 = vrot.lane.b32.xlu2 %v2949_v50, %s2316_s24 }
 0x10d   : > { %v560_v47 = vpop.permute.xlu0 %559  ;;  %v562_v56 = vpop.permute.xlu1 %561 }
 0x10e   : > { %637 = vst.msk [vmem:[#allocation2 + $0x98] sm:$0xff] %vm617_vm2, %v560_v47  ;;  %v582_v40 = vpop.permute.xlu2 %581 }
 0x10f   : > { %638 = vst.msk [vmem:[#allocation2 + $0xa0] sm:$0xff] %vm617_vm2, %v562_v56  ;;  %v3606_v56 = vld [vmem:[#allocation11_spill] sm:$0xff] }
 0x110   : > { %648 = vst.msk [vmem:[#allocation2 + $0xf0] sm:$0xff] %vm617_vm2, %v582_v40  ;;  %v3607_v40 = vld [vmem:[#allocation12_spill] sm:$0xff] }
 0x113   : > { %908 = vrot.lane.b32.xlu0 %v2369_v1, %s2317_s25  ;;  %910 = vrot.lane.b32.xlu1 %v2381_v4, %s2317_s25 }
 0x114   : > { %912 = vrot.lane.b32.xlu2 %v2375_v2, %s2317_s25 }
 0x115   : > { %v566_v59 = vpop.permute.xlu0 %565  ;;  %v568_v37 = vpop.permute.xlu1 %567 }
 0x116   : > { %640 = vst.msk [vmem:[#allocation2 + $0xb0] sm:$0xff] %vm617_vm2, %v566_v59  ;;  %v718_v44 = vpop.permute.xlu2 %717 }
 0x117   : > { %641 = vst.msk [vmem:[#allocation2 + $0xb8] sm:$0xff] %vm617_vm2, %v568_v37 }
 0x118   : > { %813 = vst.msk [vmem:[#allocation2 + $0x8] sm:$0xff] %vm811_vm3, %v718_v44  ;;  %v3608_v44 = vld [vmem:[#allocation13_spill] sm:$0xff] }
 0x11b   : > { %914 = vrot.lane.b32.xlu0 %v2387_v5, %s2317_s25  ;;  %916 = vrot.lane.b32.xlu1 %v2392_v6, %s2317_s25 }
 0x11c   : > { %918 = vrot.lane.b32.xlu2 %v2395_v7, %s2317_s25 }
 0x11d   : > { %v572_v1 = vpop.permute.xlu0 %571  ;;  %v574_v4 = vpop.permute.xlu1 %573 }
 0x11e   : > { %643 = vst.msk [vmem:[#allocation2 + $0xc8] sm:$0xff] %vm617_vm2, %v572_v1  ;;  %v724_v2 = vpop.permute.xlu2 %723 }
 0x11f   : > { %644 = vst.msk [vmem:[#allocation2 + $0xd0] sm:$0xff] %vm617_vm2, %v574_v4  ;;  %v3609_v4 = vld [vmem:[#allocation14_spill] sm:$0xff] }
 0x120   : > { %816 = vst.msk [vmem:[#allocation2 + $0x20] sm:$0xff] %vm811_vm3, %v724_v2  ;;  %v3610_v2 = vld [vmem:[#allocation15_spill] sm:$0xff] }
 0x123   : > { %920 = vrot.lane.b32.xlu0 %v2402_v8, %s2317_s25  ;;  %922 = vrot.lane.b32.xlu1 %v2407_v9, %s2317_s25 }
 0x124   : > { %924 = vrot.lane.b32.xlu2 %v2410_v10, %s2317_s25 }
 0x125   : > { %v578_v5 = vpop.permute.xlu0 %577  ;;  %v580_v6 = vpop.permute.xlu1 %579 }
 0x126   : > { %646 = vst.msk [vmem:[#allocation2 + $0xe0] sm:$0xff] %vm617_vm2, %v578_v5  ;;  %v730_v7 = vpop.permute.xlu2 %729 }
 0x127   : > { %647 = vst.msk [vmem:[#allocation2 + $0xe8] sm:$0xff] %vm617_vm2, %v580_v6 }
 0x128   : > { %819 = vst.msk [vmem:[#allocation2 + $0x38] sm:$0xff] %vm811_vm3, %v730_v7  ;;  %v3611_v7 = vld [vmem:[#allocation16_spill] sm:$0xff] }
 0x12b   : > { %926 = vrot.lane.b32.xlu0 %v2417_v11, %s2317_s25  ;;  %928 = vrot.lane.b32.xlu1 %v2422_v12, %s2317_s25 }
 0x12c   : > { %930 = vrot.lane.b32.xlu2 %v2425_v13, %s2317_s25 }
 0x12d   : > { %v584_v8 = vpop.permute.xlu0 %583  ;;  %v716_v9 = vpop.permute.xlu1 %715 }
 0x12e   : > { %649 = vst.msk [vmem:[#allocation2 + $0xf8] sm:$0xff] %vm617_vm2, %v584_v8  ;;  %v736_v10 = vpop.permute.xlu2 %735 }
 0x12f   : > { %812 = vst.msk [vmem:[#allocation2] sm:$0xff] %vm811_vm3, %v716_v9  ;;  %v3612_v9 = vld [vmem:[#allocation17_spill] sm:$0xff] }
 0x130   : > { %822 = vst.msk [vmem:[#allocation2 + $0x50] sm:$0xff] %vm811_vm3, %v736_v10  ;;  %v3613_v10 = vld [vmem:[#allocation18_spill] sm:$0xff] }
 0x133   : > { %932 = vrot.lane.b32.xlu0 %v2432_v14, %s2317_s25  ;;  %934 = vrot.lane.b32.xlu1 %v2437_v15, %s2317_s25 }
 0x134   : > { %936 = vrot.lane.b32.xlu2 %v2440_v16, %s2317_s25 }
 0x135   : > { %v720_v11 = vpop.permute.xlu0 %719  ;;  %v722_v12 = vpop.permute.xlu1 %721 }
 0x136   : > { %814 = vst.msk [vmem:[#allocation2 + $0x10] sm:$0xff] %vm811_vm3, %v720_v11  ;;  %v742_v13 = vpop.permute.xlu2 %741 }
 0x137   : > { %815 = vst.msk [vmem:[#allocation2 + $0x18] sm:$0xff] %vm811_vm3, %v722_v12 }
 0x138   : > { %825 = vst.msk [vmem:[#allocation2 + $0x68] sm:$0xff] %vm811_vm3, %v742_v13  ;;  %v3614_v13 = vld [vmem:[#allocation19_spill] sm:$0xff] }
 0x13b   : > { %938 = vrot.lane.b32.xlu0 %v2447_v17, %s2317_s25  ;;  %940 = vrot.lane.b32.xlu1 %v2452_v18, %s2317_s25 }
 0x13c   : > { %942 = vrot.lane.b32.xlu2 %v2455_v19, %s2317_s25 }
 0x13d   : > { %v726_v14 = vpop.permute.xlu0 %725  ;;  %v728_v15 = vpop.permute.xlu1 %727 }
 0x13e   : > { %817 = vst.msk [vmem:[#allocation2 + $0x28] sm:$0xff] %vm811_vm3, %v726_v14  ;;  %v748_v16 = vpop.permute.xlu2 %747 }
 0x13f   : > { %818 = vst.msk [vmem:[#allocation2 + $0x30] sm:$0xff] %vm811_vm3, %v728_v15  ;;  %v3615_v15 = vld [vmem:[#allocation20_spill] sm:$0xff] }
 0x140   : > { %828 = vst.msk [vmem:[#allocation2 + $0x80] sm:$0xff] %vm811_vm3, %v748_v16  ;;  %v3616_v16 = vld [vmem:[#allocation21_spill] sm:$0xff] }
 0x143   : > { %944 = vrot.lane.b32.xlu0 %v2462_v20, %s2317_s25  ;;  %946 = vrot.lane.b32.xlu1 %v2467_v21, %s2317_s25 }
 0x144   : > { %948 = vrot.lane.b32.xlu2 %v2470_v22, %s2317_s25 }
 0x145   : > { %v732_v17 = vpop.permute.xlu0 %731  ;;  %v734_v18 = vpop.permute.xlu1 %733 }
 0x146   : > { %820 = vst.msk [vmem:[#allocation2 + $0x40] sm:$0xff] %vm811_vm3, %v732_v17  ;;  %v754_v19 = vpop.permute.xlu2 %753 }
 0x147   : > { %821 = vst.msk [vmem:[#allocation2 + $0x48] sm:$0xff] %vm811_vm3, %v734_v18 }
 0x148   : > { %831 = vst.msk [vmem:[#allocation2 + $0x98] sm:$0xff] %vm811_vm3, %v754_v19  ;;  %v3617_v19 = vld [vmem:[#allocation22_spill] sm:$0xff] }
 0x14b   : > { %950 = vrot.lane.b32.xlu0 %v2477_v23, %s2317_s25  ;;  %952 = vrot.lane.b32.xlu1 %v2482_v24, %s2317_s25 }
 0x14c   : > { %954 = vrot.lane.b32.xlu2 %v2485_v25, %s2317_s25 }
 0x14d   : > { %v738_v20 = vpop.permute.xlu0 %737  ;;  %v740_v21 = vpop.permute.xlu1 %739 }
 0x14e   : > { %823 = vst.msk [vmem:[#allocation2 + $0x58] sm:$0xff] %vm811_vm3, %v738_v20  ;;  %v760_v22 = vpop.permute.xlu2 %759 }
 0x14f   : > { %824 = vst.msk [vmem:[#allocation2 + $0x60] sm:$0xff] %vm811_vm3, %v740_v21  ;;  %v3618_v21 = vld [vmem:[#allocation23_spill] sm:$0xff] }
 0x150   : > { %834 = vst.msk [vmem:[#allocation2 + $0xb0] sm:$0xff] %vm811_vm3, %v760_v22  ;;  %v3619_v22 = vld [vmem:[#allocation24_spill] sm:$0xff] }
 0x153   : > { %956 = vrot.lane.b32.xlu0 %v2492_v26, %s2317_s25  ;;  %958 = vrot.lane.b32.xlu1 %v2497_v27, %s2317_s25 }
 0x154   : > { %960 = vrot.lane.b32.xlu2 %v2500_v28, %s2317_s25  ;;  %v3046_v28 = vld [vmem:[%s2365_s21 + $0x181] sm:$0xff] }
 0x155   : > { %v744_v23 = vpop.permute.xlu0 %743  ;;  %v746_v24 = vpop.permute.xlu1 %745 }
 0x156   : > { %826 = vst.msk [vmem:[#allocation2 + $0x70] sm:$0xff] %vm811_vm3, %v744_v23  ;;  %v766_v25 = vpop.permute.xlu2 %765 }
 0x157   : > { %827 = vst.msk [vmem:[#allocation2 + $0x78] sm:$0xff] %vm811_vm3, %v746_v24 }
 0x158   : > { %837 = vst.msk [vmem:[#allocation2 + $0xc8] sm:$0xff] %vm811_vm3, %v766_v25  ;;  %v3620_v25 = vld [vmem:[#allocation25_spill] sm:$0xff] }
 0x15b   : > { %962 = vrot.lane.b32.xlu0 %v2507_v29, %s2317_s25  ;;  %964 = vrot.lane.b32.xlu1 %v2512_v30, %s2317_s25 }
 0x15c   : > { %966 = vrot.lane.b32.xlu2 %v2515_v31, %s2317_s25  ;;  %v3599_v31 = vld [vmem:[#allocation4_spill] sm:$0xff] }
 0x15d   : > { %v750_v26 = vpop.permute.xlu0 %749  ;;  %v752_v27 = vpop.permute.xlu1 %751 }
 0x15e   : > { %829 = vst.msk [vmem:[#allocation2 + $0x88] sm:$0xff] %vm811_vm3, %v750_v26  ;;  %v772_v36 = vpop.permute.xlu2 %771 }
 0x15f   : > { %830 = vst.msk [vmem:[#allocation2 + $0x90] sm:$0xff] %vm811_vm3, %v752_v27  ;;  %v3621_v27 = vld [vmem:[#allocation26_spill] sm:$0xff] }
 0x160   : > { %840 = vst.msk [vmem:[#allocation2 + $0xe0] sm:$0xff] %vm811_vm3, %v772_v36  ;;  %v3622_v36 = vld [vmem:[#allocation27_spill] sm:$0xff] }
 0x163   : > { %968 = vrot.lane.b32.xlu0 %v3046_v28, %s2317_s25  ;;  %970 = vrot.lane.b32.xlu1 %v3049_v34, %s2317_s25 }
 0x164   : > { %1101 = vrot.lane.b32.xlu2 %v3599_v31, %s2318_s26  ;;  %v3623_v31 = vld [vmem:[#allocation28_spill] sm:$0xff] }
 0x165   : > { %v756_v29 = vpop.permute.xlu0 %755  ;;  %v758_v30 = vpop.permute.xlu1 %757 }
 0x166   : > { %832 = vst.msk [vmem:[#allocation2 + $0xa0] sm:$0xff] %vm811_vm3, %v756_v29  ;;  %v778_v38 = vpop.permute.xlu2 %777 }
 0x167   : > { %833 = vst.msk [vmem:[#allocation2 + $0xa8] sm:$0xff] %vm811_vm3, %v758_v30 }
 0x168   : > { %843 = vst.msk [vmem:[#allocation2 + $0xf8] sm:$0xff] %vm811_vm3, %v778_v38 }
 0x16b   : > { %1103 = vrot.lane.b32.xlu0 %v3600_v42, %s2318_s26  ;;  %1105 = vrot.lane.b32.xlu1 %v3601_v45, %s2318_s26  ;;  %v3624_v42 = vld [vmem:[#allocation29_spill] sm:$0xff]  ;;  %v3625_v45 = vld [vmem:[#allocation30_spill] sm:$0xff] }
 0x16c   : > { %1107 = vrot.lane.b32.xlu2 %v3602_v52, %s2318_s26  ;;  %v3626_v52 = vld [vmem:[#allocation31_spill] sm:$0xff] }
 0x16d   : > { %v762_v60 = vpop.permute.xlu0 %761  ;;  %v764_v61 = vpop.permute.xlu1 %763 }
 0x16e   : > { %835 = vst.msk [vmem:[#allocation2 + $0xb8] sm:$0xff] %vm811_vm3, %v762_v60  ;;  %v913_v3 = vpop.permute.xlu2 %912 }
 0x16f   : > { %836 = vst.msk [vmem:[#allocation2 + $0xc0] sm:$0xff] %vm811_vm3, %v764_v61 }
 0x170   : > { %1007 = vst.msk [vmem:[#allocation2 + $0x10] sm:$0xff] %vm1004_vm4, %v913_v3 }
 0x173   : > { %1109 = vrot.lane.b32.xlu0 %v3603_v63, %s2318_s26  ;;  %1111 = vrot.lane.b32.xlu1 %v3604_v48, %s2318_s26  ;;  %v3627_v63 = vld [vmem:[#allocation32_spill] sm:$0xff]  ;;  %v3628_v48 = vld [vmem:[#allocation33_spill] sm:$0xff] }
 0x174   : > { %1113 = vrot.lane.b32.xlu2 %v3605_v35, %s2318_s26 }
 0x175   : > { %v768_v57 = vpop.permute.xlu0 %767  ;;  %v770_v54 = vpop.permute.xlu1 %769 }
 0x176   : > { %838 = vst.msk [vmem:[#allocation2 + $0xd0] sm:$0xff] %vm811_vm3, %v768_v57  ;;  %v919_v47 = vpop.permute.xlu2 %918  ;;  %v3147_v57 = vld [vmem:[%s2365_s21 + $0x182] sm:$0xff] }
 0x177   : > { %839 = vst.msk [vmem:[#allocation2 + $0xd8] sm:$0xff] %vm811_vm3, %v770_v54 }
 0x178   : > { %1010 = vst.msk [vmem:[#allocation2 + $0x28] sm:$0xff] %vm1004_vm4, %v919_v47  ;;  %v3154_v47 = vld [vmem:[%s2365_s21 + $0x18a] sm:$0xff] }
 0x17b   : > { %1115 = vrot.lane.b32.xlu0 %v3606_v56, %s2318_s26  ;;  %1117 = vrot.lane.b32.xlu1 %v3607_v40, %s2318_s26  ;;  %v2153_v56 = vld [vmem:[%s2365_s21 + $0x30] sm:$0xff] }
 0x17c   : > { %1119 = vrot.lane.b32.xlu2 %v3608_v44, %s2318_s26 }
 0x17d   : > { %v774_v59 = vpop.permute.xlu0 %773  ;;  %v776_v37 = vpop.permute.xlu1 %775 }
 0x17e   : > { %841 = vst.msk [vmem:[#allocation2 + $0xe8] sm:$0xff] %vm811_vm3, %v774_v59  ;;  %v925_v1 = vpop.permute.xlu2 %924  ;;  %v2154_v59 = vld [vmem:[%s2365_s21 + $0x38] sm:$0xff] }
 0x17f   : > { %842 = vst.msk [vmem:[#allocation2 + $0xf0] sm:$0xff] %vm811_vm3, %v776_v37 }
 0x180   : > { %1013 = vst.msk [vmem:[#allocation2 + $0x40] sm:$0xff] %vm1004_vm4, %v925_v1 }
 0x183   : > { %1121 = vrot.lane.b32.xlu0 %v3609_v4, %s2318_s26  ;;  %1123 = vrot.lane.b32.xlu1 %v3610_v2, %s2318_s26  ;;  %v2157_v4 = vld [vmem:[%s2365_s21 + $0x60] sm:$0xff] }
 0x184   : > { %1125 = vrot.lane.b32.xlu2 %v3611_v7, %s2318_s26 }
 0x185   : > { %v909_v5 = vpop.permute.xlu0 %908  ;;  %v911_v6 = vpop.permute.xlu1 %910 }
 0x186   : > { %1005 = vst.msk [vmem:[#allocation2] sm:$0xff] %vm1004_vm4, %v909_v5  ;;  %v931_v8 = vpop.permute.xlu2 %930 }
 0x187   : > { %1006 = vst.msk [vmem:[#allocation2 + $0x8] sm:$0xff] %vm1004_vm4, %v911_v6 }
 0x188   : > { %1016 = vst.msk [vmem:[#allocation2 + $0x58] sm:$0xff] %vm1004_vm4, %v931_v8 }
 0x18b   : > { %1127 = vrot.lane.b32.xlu0 %v3612_v9, %s2318_s26  ;;  %1129 = vrot.lane.b32.xlu1 %v3613_v10, %s2318_s26 }
 0x18c   : > { %1131 = vrot.lane.b32.xlu2 %v3614_v13, %s2318_s26 }
 0x18d   : > { %v915_v11 = vpop.permute.xlu0 %914  ;;  %v917_v12 = vpop.permute.xlu1 %916 }
 0x18e   : > { %1008 = vst.msk [vmem:[#allocation2 + $0x18] sm:$0xff] %vm1004_vm4, %v915_v11  ;;  %v937_v14 = vpop.permute.xlu2 %936 }
 0x18f   : > { %1009 = vst.msk [vmem:[#allocation2 + $0x20] sm:$0xff] %vm1004_vm4, %v917_v12 }
 0x190   : > { %1019 = vst.msk [vmem:[#allocation2 + $0x70] sm:$0xff] %vm1004_vm4, %v937_v14  ;;  %v2184_v14 = vld [vmem:[%s2365_s21 + $0x1a0] sm:$0xff] }
 0x193   : > { %1133 = vrot.lane.b32.xlu0 %v3615_v15, %s2318_s26  ;;  %1135 = vrot.lane.b32.xlu1 %v3616_v16, %s2318_s26 }
 0x194   : > { %1137 = vrot.lane.b32.xlu2 %v3617_v19, %s2318_s26 }
 0x195   : > { %v921_v17 = vpop.permute.xlu0 %920  ;;  %v923_v18 = vpop.permute.xlu1 %922 }
 0x196   : > { %1011 = vst.msk [vmem:[#allocation2 + $0x30] sm:$0xff] %vm1004_vm4, %v921_v17  ;;  %v943_v20 = vpop.permute.xlu2 %942  ;;  %v2216_v17 = vld [vmem:[%s2365_s21 + $0x1a1] sm:$0xff] }
 0x197   : > { %1012 = vst.msk [vmem:[#allocation2 + $0x38] sm:$0xff] %vm1004_vm4, %v923_v18  ;;  %v2232_v18 = vld [vmem:[%s2365_s21 + $0xe2] sm:$0xff] }
 0x198   : > { %1022 = vst.msk [vmem:[#allocation2 + $0x88] sm:$0xff] %vm1004_vm4, %v943_v20 }
 0x19b   : > { %1139 = vrot.lane.b32.xlu0 %v3618_v21, %s2318_s26  ;;  %1141 = vrot.lane.b32.xlu1 %v3619_v22, %s2318_s26  ;;  %v2183_v22 = vld [vmem:[%s2365_s21 + $0x198] sm:$0xff] }
 0x19c   : > { %1143 = vrot.lane.b32.xlu2 %v3620_v25, %s2318_s26  ;;  %v2215_v25 = vld [vmem:[%s2365_s21 + $0x199] sm:$0xff] }
 0x19d   : > { %v927_v23 = vpop.permute.xlu0 %926  ;;  %v929_v24 = vpop.permute.xlu1 %928 }
 0x19e   : > { %1014 = vst.msk [vmem:[#allocation2 + $0x48] sm:$0xff] %vm1004_vm4, %v927_v23  ;;  %v949_v26 = vpop.permute.xlu2 %948  ;;  %v2199_v23 = vld [vmem:[%s2365_s21 + $0xd9] sm:$0xff] }
 0x19f   : > { %1015 = vst.msk [vmem:[#allocation2 + $0x50] sm:$0xff] %vm1004_vm4, %v929_v24 }
 0x1a0   : > { %1025 = vst.msk [vmem:[#allocation2 + $0xa0] sm:$0xff] %vm1004_vm4, %v949_v26 }
 0x1a3   : > { %1145 = vrot.lane.b32.xlu0 %v3621_v27, %s2318_s26  ;;  %1147 = vrot.lane.b32.xlu1 %v3622_v36, %s2318_s26  ;;  %v2231_v36 = vld [vmem:[%s2365_s21 + $0xda] sm:$0xff] }
 0x1a4   : > { %1149 = vrot.lane.b32.xlu2 %v3623_v31, %s2318_s26 }
 0x1a5   : > { %v933_v29 = vpop.permute.xlu0 %932  ;;  %v935_v30 = vpop.permute.xlu1 %934 }
 0x1a6   : > { %1017 = vst.msk [vmem:[#allocation2 + $0x60] sm:$0xff] %vm1004_vm4, %v933_v29  ;;  %v955_v38 = vpop.permute.xlu2 %954  ;;  %v2247_v29 = vld [vmem:[%s2365_s21 + $0x19a] sm:$0xff] }
 0x1a7   : > { %1018 = vst.msk [vmem:[#allocation2 + $0x68] sm:$0xff] %vm1004_vm4, %v935_v30 }
 0x1a8   : > { %1028 = vst.msk [vmem:[#allocation2 + $0xb8] sm:$0xff] %vm1004_vm4, %v955_v38 }
 0x1ab   : > { %1151 = vrot.lane.b32.xlu0 %v3624_v42, %s2318_s26  ;;  %1153 = vrot.lane.b32.xlu1 %v3625_v45, %s2318_s26  ;;  %v2198_v42 = vld [vmem:[%s2365_s21 + $0xc9] sm:$0xff] }
 0x1ac   : > { %1155 = vrot.lane.b32.xlu2 %v3626_v52, %s2318_s26 }
 0x1ad   : > { %v939_v60 = vpop.permute.xlu0 %938  ;;  %v941_v61 = vpop.permute.xlu1 %940 }
 0x1ae   : > { %1020 = vst.msk [vmem:[#allocation2 + $0x78] sm:$0xff] %vm1004_vm4, %v939_v60  ;;  %v961_v3 = vpop.permute.xlu2 %960  ;;  %v2230_v60 = vld [vmem:[%s2365_s21 + $0xca] sm:$0xff] }
 0x1af   : > { %1021 = vst.msk [vmem:[#allocation2 + $0x80] sm:$0xff] %vm1004_vm4, %v941_v61 }
 0x1b0   : > { %1031 = vst.msk [vmem:[#allocation2 + $0xd0] sm:$0xff] %vm1004_vm4, %v961_v3 }
 0x1b3   : > { %1157 = vrot.lane.b32.xlu0 %v3627_v63, %s2318_s26  ;;  %1159 = vrot.lane.b32.xlu1 %v3628_v48, %s2318_s26  ;;  %v2229_v48 = vld [vmem:[%s2365_s21 + $0xc2] sm:$0xff] }
 0x1b4   : > { %1161 = vrot.lane.b32.xlu2 %v3147_v57, %s2318_s26 }
 0x1b5   : > { %v945_v54 = vpop.permute.xlu0 %944  ;;  %v947_v35 = vpop.permute.xlu1 %946 }
 0x1b6   : > { %1023 = vst.msk [vmem:[#allocation2 + $0x90] sm:$0xff] %vm1004_vm4, %v945_v54  ;;  %v967_v40 = vpop.permute.xlu2 %966 }
 0x1b7   : > { %1024 = vst.msk [vmem:[#allocation2 + $0x98] sm:$0xff] %vm1004_vm4, %v947_v35 }
 0x1b8   : > { %1034 = vst.msk [vmem:[#allocation2 + $0xe8] sm:$0xff] %vm1004_vm4, %v967_v40 }
 0x1bb   : > { %1163 = vrot.lane.b32.xlu0 %v3154_v47, %s2318_s26  ;;  %1295 = vrot.lane.b32.xlu1 %v2153_v56, %s2319_s27 }
 0x1bc   : > { %1297 = vrot.lane.b32.xlu2 %v2154_v59, %s2319_s27 }
 0x1bd   : > { %v951_v37 = vpop.permute.xlu0 %950  ;;  %v953_v44 = vpop.permute.xlu1 %952 }
 0x1be   : > { %1026 = vst.msk [vmem:[#allocation2 + $0xa8] sm:$0xff] %vm1004_vm4, %v951_v37  ;;  %v1102_v1 = vpop.permute.xlu2 %1101  ;;  %v2244_v37 = vld [vmem:[%s2365_s21 + $0x172] sm:$0xff] }
 0x1bf   : > { %1027 = vst.msk [vmem:[#allocation2 + $0xb0] sm:$0xff] %vm1004_vm4, %v953_v44 }
 0x1c0   : > { %1198 = vst.msk [vmem:[#allocation2] sm:$0xff] %vm1197_vm5, %v1102_v1 }
 0x1c3   : > { %1299 = vrot.lane.b32.xlu0 %v2572_v46, %s2319_s27  ;;  %1301 = vrot.lane.b32.xlu1 %v2595_v51, %s2319_s27  ;;  %v2160_v46 = vld [vmem:[%s2365_s21 + $0x80] sm:$0xff] }
 0x1c4   : > { %1303 = vrot.lane.b32.xlu2 %v2157_v4, %s2319_s27 }
 0x1c5   : > { %v957_v2 = vpop.permute.xlu0 %956  ;;  %v959_v5 = vpop.permute.xlu1 %958 }
 0x1c6   : > { %1029 = vst.msk [vmem:[#allocation2 + $0xc0] sm:$0xff] %vm1004_vm4, %v957_v2  ;;  %v1108_v6 = vpop.permute.xlu2 %1107  ;;  %v2195_v2 = vld [vmem:[%s2365_s21 + $0xa9] sm:$0xff] }
 0x1c7   : > { %1030 = vst.msk [vmem:[#allocation2 + $0xc8] sm:$0xff] %vm1004_vm4, %v959_v5  ;;  %v2211_v5 = vld [vmem:[%s2365_s21 + $0x169] sm:$0xff] }
 0x1c8   : > { %1201 = vst.msk [vmem:[#allocation2 + $0x18] sm:$0xff] %vm1197_vm5, %v1108_v6 }
 0x1cb   : > { %1305 = vrot.lane.b32.xlu0 %v2603_v53, %s2319_s27  ;;  %1307 = vrot.lane.b32.xlu1 %v2626_v58, %s2319_s27  ;;  %v2163_v53 = vld [vmem:[%s2365_s21 + $0xa8] sm:$0xff] }
 0x1cc   : > { %1309 = vrot.lane.b32.xlu2 %v2160_v46, %s2319_s27  ;;  %v2227_v46 = vld [vmem:[%s2365_s21 + $0xaa] sm:$0xff] }
 0x1cd   : > { %v963_v51 = vpop.permute.xlu0 %962  ;;  %v965_v7 = vpop.permute.xlu1 %964 }
 0x1ce   : > { %1032 = vst.msk [vmem:[#allocation2 + $0xd8] sm:$0xff] %vm1004_vm4, %v963_v51  ;;  %v1114_v8 = vpop.permute.xlu2 %1113 }
 0x1cf   : > { %1033 = vst.msk [vmem:[#allocation2 + $0xe0] sm:$0xff] %vm1004_vm4, %v965_v7 }
 0x1d0   : > { %1204 = vst.msk [vmem:[#allocation2 + $0x30] sm:$0xff] %vm1197_vm5, %v1114_v8  ;;  %v2243_v8 = vld [vmem:[%s2365_s21 + $0x16a] sm:$0xff] }
 0x1d3   : > { %1311 = vrot.lane.b32.xlu0 %v2636_v62, %s2319_s27  ;;  %1313 = vrot.lane.b32.xlu1 %v2659_v33, %s2319_s27  ;;  %v2166_v62 = vld [vmem:[%s2365_s21 + $0xc8] sm:$0xff] }
 0x1d4   : > { %1315 = vrot.lane.b32.xlu2 %v2163_v53, %s2319_s27  ;;  %v2178_v53 = vld [vmem:[%s2365_s21 + $0x158] sm:$0xff] }
 0x1d5   : > { %v969_v58 = vpop.permute.xlu0 %968  ;;  %v971_v9 = vpop.permute.xlu1 %970 }
 0x1d6   : > { %1035 = vst.msk [vmem:[#allocation2 + $0xf0] sm:$0xff] %vm1004_vm4, %v969_v58  ;;  %v1120_v10 = vpop.permute.xlu2 %1119 }
 0x1d7   : > { %1036 = vst.msk [vmem:[#allocation2 + $0xf8] sm:$0xff] %vm1004_vm4, %v971_v9  ;;  %v2194_v9 = vld [vmem:[%s2365_s21 + $0x99] sm:$0xff] }
 0x1d8   : > { %1207 = vst.msk [vmem:[#allocation2 + $0x48] sm:$0xff] %vm1197_vm5, %v1120_v10 }
 0x1db   : > { %1317 = vrot.lane.b32.xlu0 %v2669_v49, %s2319_s27  ;;  %1319 = vrot.lane.b32.xlu1 %v2692_v39, %s2319_s27  ;;  %v2169_v49 = vld [vmem:[%s2365_s21 + $0xf0] sm:$0xff] }
 0x1dc   : > { %1321 = vrot.lane.b32.xlu2 %v2166_v62, %s2319_s27 }
 0x1dd   : > { %v1104_v33 = vpop.permute.xlu0 %1103  ;;  %v1106_v11 = vpop.permute.xlu1 %1105 }
 0x1de   : > { %1199 = vst.msk [vmem:[#allocation2 + $0x8] sm:$0xff] %vm1197_vm5, %v1104_v33  ;;  %v1126_v12 = vpop.permute.xlu2 %1125  ;;  %v2210_v33 = vld [vmem:[%s2365_s21 + $0x159] sm:$0xff] }
 0x1df   : > { %1200 = vst.msk [vmem:[#allocation2 + $0x10] sm:$0xff] %vm1197_vm5, %v1106_v11  ;;  %v2226_v11 = vld [vmem:[%s2365_s21 + $0x9a] sm:$0xff] }
 0x1e0   : > { %1210 = vst.msk [vmem:[#allocation2 + $0x60] sm:$0xff] %vm1197_vm5, %v1126_v12 }
 0x1e3   : > { %1323 = vrot.lane.b32.xlu0 %v2702_v0, %s2319_s27  ;;  %1325 = vrot.lane.b32.xlu1 %v2725_v32, %s2319_s27  ;;  %v2200_v0 = vld [vmem:[%s2365_s21 + $0xe1] sm:$0xff] }
 0x1e4   : > { %1327 = vrot.lane.b32.xlu2 %v2169_v49, %s2319_s27  ;;  %v2242_v49 = vld [vmem:[%s2365_s21 + $0x15a] sm:$0xff] }
 0x1e5   : > { %v1110_v39 = vpop.permute.xlu0 %1109  ;;  %v1112_v13 = vpop.permute.xlu1 %1111 }
 0x1e6   : > { %1202 = vst.msk [vmem:[#allocation2 + $0x20] sm:$0xff] %vm1197_vm5, %v1110_v39  ;;  %v1132_v15 = vpop.permute.xlu2 %1131 }
 0x1e7   : > { %1203 = vst.msk [vmem:[#allocation2 + $0x28] sm:$0xff] %vm1197_vm5, %v1112_v13 }
 0x1e8   : > { %1213 = vst.msk [vmem:[#allocation2 + $0x78] sm:$0xff] %vm1197_vm5, %v1132_v15  ;;  %v2193_v15 = vld [vmem:[%s2365_s21 + $0x91] sm:$0xff] }
 0x1eb   : > { %1329 = vrot.lane.b32.xlu0 %v2735_v55, %s2319_s27  ;;  %1357 = vrot.lane.b32.xlu1 %v2184_v14, %s2319_s27  ;;  %v2248_v55 = vld [vmem:[%s2365_s21 + $0x1a2] sm:$0xff]  ;;  %v2177_v14 = vld [vmem:[%s2365_s21 + $0x150] sm:$0xff] }
 0x1ec   : > { %1518 = vrot.lane.b32.xlu2 %v2200_v0, %s2320_s28 }
 0x1ed   : > { %v1116_v32 = vpop.permute.xlu0 %1115  ;;  %v1118_v16 = vpop.permute.xlu1 %1117 }
 0x1ee   : > { %1205 = vst.msk [vmem:[#allocation2 + $0x38] sm:$0xff] %vm1197_vm5, %v1116_v32  ;;  %v1138_v19 = vpop.permute.xlu2 %1137  ;;  %v2209_v32 = vld [vmem:[%s2365_s21 + $0x151] sm:$0xff] }
 0x1ef   : > { %1206 = vst.msk [vmem:[#allocation2 + $0x40] sm:$0xff] %vm1197_vm5, %v1118_v16 }
 0x1f0   : > { %1216 = vst.msk [vmem:[#allocation2 + $0x90] sm:$0xff] %vm1197_vm5, %v1138_v19  ;;  %v2241_v19 = vld [vmem:[%s2365_s21 + $0x152] sm:$0xff] }
 0x1f3   : > { %1550 = vrot.lane.b32.xlu0 %v2216_v17, %s2320_s28  ;;  %1711 = vrot.lane.b32.xlu1 %v2232_v18, %s2321_s29  ;;  %v2225_v18 = vld [vmem:[%s2365_s21 + $0x92] sm:$0xff] }
 0x1f4   : > { %1743 = vrot.lane.b32.xlu2 %v2248_v55, %s2321_s29 }
 0x1f5   : > { %v1122_v20 = vpop.permute.xlu0 %1121  ;;  %v1124_v21 = vpop.permute.xlu1 %1123 }
 0x1f6   : > { %1208 = vst.msk [vmem:[#allocation2 + $0x50] sm:$0xff] %vm1197_vm5, %v1122_v20  ;;  %v1144_v24 = vpop.permute.xlu2 %1143  ;;  %v2176_v20 = vld [vmem:[%s2365_s21 + $0x140] sm:$0xff] }
 0x1f7   : > { %1209 = vst.msk [vmem:[#allocation2 + $0x58] sm:$0xff] %vm1197_vm5, %v1124_v21 }
 0x1f8   : > { %1219 = vst.msk [vmem:[#allocation2 + $0xa8] sm:$0xff] %vm1197_vm5, %v1144_v24  ;;  %v2208_v24 = vld [vmem:[%s2365_s21 + $0x141] sm:$0xff] }
 0x1fb   : > { %1355 = vrot.lane.b32.xlu0 %v2183_v22, %s2319_s27  ;;  %1516 = vrot.lane.b32.xlu1 %v2199_v23, %s2320_s28  ;;  %v2192_v23 = vld [vmem:[%s2365_s21 + $0x81] sm:$0xff] }
 0x1fc   : > { %1548 = vrot.lane.b32.xlu2 %v2215_v25, %s2320_s28 }
 0x1fd   : > { %v1128_v26 = vpop.permute.xlu0 %1127  ;;  %v1130_v27 = vpop.permute.xlu1 %1129 }
 0x1fe   : > { %1211 = vst.msk [vmem:[#allocation2 + $0x68] sm:$0xff] %vm1197_vm5, %v1128_v26  ;;  %v1150_v30 = vpop.permute.xlu2 %1149  ;;  %v2224_v26 = vld [vmem:[%s2365_s21 + $0x82] sm:$0xff] }
 0x1ff   : > { %1212 = vst.msk [vmem:[#allocation2 + $0x70] sm:$0xff] %vm1197_vm5, %v1130_v27 }
 0x200   : > { %1222 = vst.msk [vmem:[#allocation2 + $0xc0] sm:$0xff] %vm1197_vm5, %v1150_v30  ;;  %v2175_v30 = vld [vmem:[%s2365_s21 + $0x138] sm:$0xff] }
 0x203   : > { %1709 = vrot.lane.b32.xlu0 %v2231_v36, %s2321_s29  ;;  %1741 = vrot.lane.b32.xlu1 %v2247_v29, %s2321_s29  ;;  %v2240_v29 = vld [vmem:[%s2365_s21 + $0x142] sm:$0xff] }
 0x204   : > { %1353 = vrot.lane.b32.xlu2 %v2949_v50, %s2319_s27 }
 0x205   : > { %v1134_v31 = vpop.permute.xlu0 %1133  ;;  %v1136_v38 = vpop.permute.xlu1 %1135 }
 0x206   : > { %1214 = vst.msk [vmem:[#allocation2 + $0x80] sm:$0xff] %vm1197_vm5, %v1134_v31  ;;  %v1156_v45 = vpop.permute.xlu2 %1155 }
 0x207   : > { %1215 = vst.msk [vmem:[#allocation2 + $0x88] sm:$0xff] %vm1197_vm5, %v1136_v38  ;;  %v2191_v38 = vld [vmem:[%s2365_s21 + $0x79] sm:$0xff] }
 0x208   : > { %1225 = vst.msk [vmem:[#allocation2 + $0xd8] sm:$0xff] %vm1197_vm5, %v1156_v45 }
 0x20b   : > { %1514 = vrot.lane.b32.xlu0 %v2198_v42, %s2320_s28  ;;  %1546 = vrot.lane.b32.xlu1 %v3049_v34, %s2320_s28  ;;  %v2197_v34 = vld [vmem:[%s2365_s21 + $0xc1] sm:$0xff] }
 0x20c   : > { %1707 = vrot.lane.b32.xlu2 %v2230_v60, %s2321_s29  ;;  %v2207_v60 = vld [vmem:[%s2365_s21 + $0x139] sm:$0xff] }
 0x20d   : > { %v1140_v61 = vpop.permute.xlu0 %1139  ;;  %v1142_v52 = vpop.permute.xlu1 %1141 }
 0x20e   : > { %1217 = vst.msk [vmem:[#allocation2 + $0x98] sm:$0xff] %vm1197_vm5, %v1140_v61  ;;  %v1162_v50 = vpop.permute.xlu2 %1161  ;;  %v2223_v61 = vld [vmem:[%s2365_s21 + $0x7a] sm:$0xff] }
 0x20f   : > { %1218 = vst.msk [vmem:[#allocation2 + $0xa0] sm:$0xff] %vm1197_vm5, %v1142_v52 }
 0x210   : > { %1228 = vst.msk [vmem:[#allocation2 + $0xf0] sm:$0xff] %vm1197_vm5, %v1162_v50  ;;  %v2239_v50 = vld [vmem:[%s2365_s21 + $0x13a] sm:$0xff] }
 0x213   : > { %1739 = vrot.lane.b32.xlu0 %v3154_v47, %s2321_s29  ;;  %1351 = vrot.lane.b32.xlu1 %v2941_v41, %s2319_s27  ;;  %v2196_v47 = vld [vmem:[%s2365_s21 + $0xb1] sm:$0xff] }
 0x214   : > { %1512 = vrot.lane.b32.xlu2 %v2197_v34, %s2320_s28 }
 0x215   : > { %v1146_v3 = vpop.permute.xlu0 %1145  ;;  %v1148_v63 = vpop.permute.xlu1 %1147 }
 0x216   : > { %1220 = vst.msk [vmem:[#allocation2 + $0xb0] sm:$0xff] %vm1197_vm5, %v1146_v3  ;;  %v1298_v54 = vpop.permute.xlu2 %1297 }
 0x217   : > { %1221 = vst.msk [vmem:[#allocation2 + $0xb8] sm:$0xff] %vm1197_vm5, %v1148_v63 }
 0x218   : > { %1393 = vst.msk [vmem:[#allocation2 + $0x8] sm:$0xff] %vm1391_vm6, %v1298_v54  ;;  %v2174_v54 = vld [vmem:[%s2365_s21 + $0x128] sm:$0xff] }
 0x21b   : > { %1544 = vrot.lane.b32.xlu0 %v3046_v28, %s2320_s28  ;;  %1705 = vrot.lane.b32.xlu1 %v2229_v48, %s2321_s29  ;;  %v2212_v28 = vld [vmem:[%s2365_s21 + $0x171] sm:$0xff] }
 0x21c   : > { %1737 = vrot.lane.b32.xlu2 %v3147_v57, %s2321_s29  ;;  %v2228_v57 = vld [vmem:[%s2365_s21 + $0xb2] sm:$0xff] }
 0x21d   : > { %v1152_v41 = vpop.permute.xlu0 %1151  ;;  %v1154_v35 = vpop.permute.xlu1 %1153 }
 0x21e   : > { %1223 = vst.msk [vmem:[#allocation2 + $0xc8] sm:$0xff] %vm1197_vm5, %v1152_v41  ;;  %v1304_v56 = vpop.permute.xlu2 %1303  ;;  %v2190_v41 = vld [vmem:[%s2365_s21 + $0x69] sm:$0xff] }
 0x21f   : > { %1224 = vst.msk [vmem:[#allocation2 + $0xd0] sm:$0xff] %vm1197_vm5, %v1154_v35 }
 0x220   : > { %1396 = vst.msk [vmem:[#allocation2 + $0x20] sm:$0xff] %vm1391_vm6, %v1304_v56 }
 0x223   : > { %1349 = vrot.lane.b32.xlu0 %v2851_v43, %s2319_s27  ;;  %1510 = vrot.lane.b32.xlu1 %v2196_v47, %s2320_s28  ;;  %v2179_v43 = vld [vmem:[%s2365_s21 + $0x168] sm:$0xff] }
 0x224   : > { %1542 = vrot.lane.b32.xlu2 %v2212_v28, %s2320_s28  ;;  %v2206_v47 = vld [vmem:[%s2365_s21 + $0x129] sm:$0xff] }
 0x225   : > { %v1158_v40 = vpop.permute.xlu0 %1157  ;;  %v1160_v59 = vpop.permute.xlu1 %1159 }
 0x226   : > { %1226 = vst.msk [vmem:[#allocation2 + $0xe0] sm:$0xff] %vm1197_vm5, %v1158_v40  ;;  %v1310_v44 = vpop.permute.xlu2 %1309  ;;  %v2222_v40 = vld [vmem:[%s2365_s21 + $0x6a] sm:$0xff] }
 0x227   : > { %1227 = vst.msk [vmem:[#allocation2 + $0xe8] sm:$0xff] %vm1197_vm5, %v1160_v59  ;;  %v2238_v59 = vld [vmem:[%s2365_s21 + $0x12a] sm:$0xff] }
 0x228   : > { %1399 = vst.msk [vmem:[#allocation2 + $0x38] sm:$0xff] %vm1391_vm6, %v1310_v44 }
 0x22b   : > { %1703 = vrot.lane.b32.xlu0 %v2228_v57, %s2321_s29  ;;  %1735 = vrot.lane.b32.xlu1 %v2244_v37, %s2321_s29  ;;  %v2173_v37 = vld [vmem:[%s2365_s21 + $0x120] sm:$0xff] }
 0x22c   : > { %1347 = vrot.lane.b32.xlu2 %v2179_v43, %s2319_s27 }
 0x22d   : > { %v1164_v1 = vpop.permute.xlu0 %1163  ;;  %v1296_v4 = vpop.permute.xlu1 %1295 }
 0x22e   : > { %1229 = vst.msk [vmem:[#allocation2 + $0xf8] sm:$0xff] %vm1197_vm5, %v1164_v1  ;;  %v1316_v6 = vpop.permute.xlu2 %1315 }
 0x22f   : > { %1392 = vst.msk [vmem:[#allocation2] sm:$0xff] %vm1391_vm6, %v1296_v4 }
 0x230   : > { %1402 = vst.msk [vmem:[#allocation2 + $0x50] sm:$0xff] %vm1391_vm6, %v1316_v6 }
 0x233   : > { %1508 = vrot.lane.b32.xlu0 %v2195_v2, %s2320_s28  ;;  %1540 = vrot.lane.b32.xlu1 %v2211_v5, %s2320_s28  ;;  %v2189_v2 = vld [vmem:[%s2365_s21 + $0x61] sm:$0xff] }
 0x234   : > { %1701 = vrot.lane.b32.xlu2 %v2227_v46, %s2321_s29  ;;  %v2205_v5 = vld [vmem:[%s2365_s21 + $0x121] sm:$0xff] }
 0x235   : > { %v1300_v51 = vpop.permute.xlu0 %1299  ;;  %v1302_v7 = vpop.permute.xlu1 %1301  ;;  %v2221_v46 = vld [vmem:[%s2365_s21 + $0x62] sm:$0xff] }
 0x236   : > { %1394 = vst.msk [vmem:[#allocation2 + $0x10] sm:$0xff] %vm1391_vm6, %v1300_v51  ;;  %v1322_v58 = vpop.permute.xlu2 %1321 }
 0x237   : > { %1395 = vst.msk [vmem:[#allocation2 + $0x18] sm:$0xff] %vm1391_vm6, %v1302_v7 }
 0x238   : > { %1405 = vst.msk [vmem:[#allocation2 + $0x68] sm:$0xff] %vm1391_vm6, %v1322_v58  ;;  %v2172_v58 = vld [vmem:[%s2365_s21 + $0x110] sm:$0xff] }
 0x23b   : > { %1733 = vrot.lane.b32.xlu0 %v2243_v8, %s2321_s29  ;;  %1345 = vrot.lane.b32.xlu1 %v2178_v53, %s2319_s27  ;;  %v2237_v53 = vld [vmem:[%s2365_s21 + $0x122] sm:$0xff] }
 0x23c   : > { %1506 = vrot.lane.b32.xlu2 %v2194_v9, %s2320_s28 }
 0x23d   : > { %v1306_v10 = vpop.permute.xlu0 %1305  ;;  %v1308_v62 = vpop.permute.xlu1 %1307 }
 0x23e   : > { %1397 = vst.msk [vmem:[#allocation2 + $0x28] sm:$0xff] %vm1391_vm6, %v1306_v10  ;;  %v1328_v12 = vpop.permute.xlu2 %1327  ;;  %v2188_v10 = vld [vmem:[%s2365_s21 + $0x51] sm:$0xff] }
 0x23f   : > { %1398 = vst.msk [vmem:[#allocation2 + $0x30] sm:$0xff] %vm1391_vm6, %v1308_v62 }
 0x240   : > { %1408 = vst.msk [vmem:[#allocation2 + $0x80] sm:$0xff] %vm1391_vm6, %v1328_v12  ;;  %v2204_v12 = vld [vmem:[%s2365_s21 + $0x111] sm:$0xff] }
 0x243   : > { %1538 = vrot.lane.b32.xlu0 %v2210_v33, %s2320_s28  ;;  %1699 = vrot.lane.b32.xlu1 %v2226_v11, %s2321_s29 }
 0x244   : > { %1731 = vrot.lane.b32.xlu2 %v2242_v49, %s2321_s29  ;;  %v2220_v49 = vld [vmem:[%s2365_s21 + $0x52] sm:$0xff] }
 0x245   : > { %v1312_v39 = vpop.permute.xlu0 %1311  ;;  %v1314_v13 = vpop.permute.xlu1 %1313 }
 0x246   : > { %1400 = vst.msk [vmem:[#allocation2 + $0x40] sm:$0xff] %vm1391_vm6, %v1312_v39  ;;  %v1519_v0 = vpop.permute.xlu2 %1518 }
 0x247   : > { %1401 = vst.msk [vmem:[#allocation2 + $0x48] sm:$0xff] %vm1391_vm6, %v1314_v13  ;;  %v2236_v13 = vld [vmem:[%s2365_s21 + $0x112] sm:$0xff] }
 0x24b   : > { %1343 = vrot.lane.b32.xlu0 %v2177_v14, %s2319_s27  ;;  %1504 = vrot.lane.b32.xlu1 %v2193_v15, %s2320_s28 }
 0x24c   : > { %1536 = vrot.lane.b32.xlu2 %v2209_v32, %s2320_s28 }
 0x24d   : > { %v1318_v16 = vpop.permute.xlu0 %1317  ;;  %v1320_v17 = vpop.permute.xlu1 %1319 }
 0x24e   : > { %1403 = vst.msk [vmem:[#allocation2 + $0x58] sm:$0xff] %vm1391_vm6, %v1318_v16  ;;  %v1744_v55 = vpop.permute.xlu2 %1743  ;;  %v2171_v16 = vld [vmem:[%s2365_s21 + $0x108] sm:$0xff] }
 0x24f   : > { %1404 = vst.msk [vmem:[#allocation2 + $0x60] sm:$0xff] %vm1391_vm6, %v1320_v17  ;;  %v2187_v17 = vld [vmem:[%s2365_s21 + $0x49] sm:$0xff] }
 0x253   : > { %1697 = vrot.lane.b32.xlu0 %v2225_v18, %s2321_s29  ;;  %1729 = vrot.lane.b32.xlu1 %v2241_v19, %s2321_s29  ;;  %v2203_v19 = vld [vmem:[%s2365_s21 + $0x109] sm:$0xff] }
 0x254   : > { %1341 = vrot.lane.b32.xlu2 %v2176_v20, %s2319_s27 }
 0x255   : > { %v1324_v21 = vpop.permute.xlu0 %1323  ;;  %v1326_v22 = vpop.permute.xlu1 %1325 }
 0x256   : > { %1406 = vst.msk [vmem:[#allocation2 + $0x70] sm:$0xff] %vm1391_vm6, %v1324_v21  ;;  %v1549_v25 = vpop.permute.xlu2 %1548  ;;  %v2219_v21 = vld [vmem:[%s2365_s21 + $0x4a] sm:$0xff] }
 0x257   : > { %1407 = vst.msk [vmem:[#allocation2 + $0x78] sm:$0xff] %vm1391_vm6, %v1326_v22  ;;  %v2235_v22 = vld [vmem:[%s2365_s21 + $0x10a] sm:$0xff] }
 0x258   : > { %1600 = vst.msk [vmem:[#allocation2 + $0x78] sm:$0xff] %vm1584_vm7, %v1519_v0 }
 0x25b   : > { %1502 = vrot.lane.b32.xlu0 %v2192_v23, %s2320_s28  ;;  %1534 = vrot.lane.b32.xlu1 %v2208_v24, %s2320_s28  ;;  %v2186_v24 = vld [vmem:[%s2365_s21 + $0x39] sm:$0xff] }
 0x25c   : > { %1695 = vrot.lane.b32.xlu2 %v2224_v26, %s2321_s29 }
 0x25d   : > { %v1330_v27 = vpop.permute.xlu0 %1329  ;;  %v1358_v36 = vpop.permute.xlu1 %1357 }
 0x25e   : > { %1409 = vst.msk [vmem:[#allocation2 + $0x88] sm:$0xff] %vm1391_vm6, %v1330_v27  ;;  %v1354_v31 = vpop.permute.xlu2 %1353 }
 0x25f   : > { %1423 = vst.msk [vmem:[#allocation2 + $0xf8] sm:$0xff] %vm1391_vm6, %v1358_v36 }
 0x260   : > { %1421 = vst.msk [vmem:[#allocation2 + $0xe8] sm:$0xff] %vm1391_vm6, %v1354_v31 }
 0x263   : > { %1727 = vrot.lane.b32.xlu0 %v2240_v29, %s2321_s29  ;;  %1339 = vrot.lane.b32.xlu1 %v2175_v30, %s2319_s27  ;;  %v2202_v29 = vld [vmem:[%s2365_s21 + $0xf9] sm:$0xff] }
 0x264   : > { %1500 = vrot.lane.b32.xlu2 %v2191_v38, %s2320_s28  ;;  %v2218_v30 = vld [vmem:[%s2365_s21 + $0x3a] sm:$0xff] }
 0x265   : > { %v1551_v42 = vpop.permute.xlu0 %1550  ;;  %v1712_v45 = vpop.permute.xlu1 %1711  ;;  %v2234_v38 = vld [vmem:[%s2365_s21 + $0xfa] sm:$0xff] }
 0x266   : > { %1616 = vst.msk [vmem:[#allocation2 + $0xf8] sm:$0xff] %vm1584_vm7, %v1551_v42  ;;  %v1708_v52 = vpop.permute.xlu2 %1707 }
 0x267   : > { %1793 = vst.msk [vmem:[#allocation2 + $0x78] sm:$0xff] %vm1777_vm8, %v1712_v45 }
 0x268   : > { %1809 = vst.msk [vmem:[#allocation2 + $0xf8] sm:$0xff] %vm1777_vm8, %v1744_v55 }
 0x26b   : > { %1532 = vrot.lane.b32.xlu0 %v2207_v60, %s2320_s28  ;;  %1693 = vrot.lane.b32.xlu1 %v2223_v61, %s2321_s29  ;;  %v2185_v61 = vld [vmem:[%s2365_s21 + $0x31] sm:$0xff] }
 0x26c   : > { %1725 = vrot.lane.b32.xlu2 %v2239_v50, %s2321_s29 }
 0x26d   : > { %v1356_v34 = vpop.permute.xlu0 %1355  ;;  %v1517_v3 = vpop.permute.xlu1 %1516 }
 0x26e   : > { %1422 = vst.msk [vmem:[#allocation2 + $0xf0] sm:$0xff] %vm1391_vm6, %v1356_v34  ;;  %v1829_v63 = vld [vmem:[#allocation2 + $0x78] sm:$0xff]  ;;  %v1513_v35 = vpop.permute.xlu2 %1512 }
 0x26f   : > { %1599 = vst.msk [vmem:[#allocation2 + $0x70] sm:$0xff] %vm1584_vm7, %v1517_v3  ;;  %2249 = vmatpush.xpose.msk.msra.mxu0 %vm1852_vm9, %v1829_v63  ;;  %v1845_v48 = vld [vmem:[#allocation2 + $0xf8] sm:$0xff] }
 0x270   : > { %1615 = vst.msk [vmem:[#allocation2 + $0xf0] sm:$0xff] %vm1584_vm7, %v1549_v25  ;;  %2266 = vmatpush.xpose.msk.msra.mxu1 %vm1852_vm9, %v1845_v48  ;;  %v2217_v34 = vld [vmem:[%s2365_s21 + $0x32] sm:$0xff] }
 0x271   : > { %1597 = vst.msk [vmem:[#allocation2 + $0x60] sm:$0xff] %vm1584_vm7, %v1513_v35 }
 0x273   : > { %1337 = vrot.lane.b32.xlu0 %v2174_v54, %s2319_s27  ;;  %1498 = vrot.lane.b32.xlu1 %v2190_v41, %s2320_s28  ;;  %v2233_v54 = vld [vmem:[%s2365_s21 + $0xf2] sm:$0xff] }
 0x274   : > { %1530 = vrot.lane.b32.xlu2 %v2206_v47, %s2320_s28 }
 0x275   : > { %v1710_v56 = vpop.permute.xlu0 %1709  ;;  %v1742_v28 = vpop.permute.xlu1 %1741 }
 0x276   : > { %1792 = vst.msk [vmem:[#allocation2 + $0x70] sm:$0xff] %vm1777_vm8, %v1710_v56  ;;  %v1738_v57 = vpop.permute.xlu2 %1737 }
 0x277   : > { %1808 = vst.msk [vmem:[#allocation2 + $0xf0] sm:$0xff] %vm1777_vm8, %v1742_v28 }
 0x27b   : > { %1691 = vrot.lane.b32.xlu0 %v2222_v40, %s2321_s29  ;;  %1723 = vrot.lane.b32.xlu1 %v2238_v59, %s2321_s29 }
 0x27c   : > { %1335 = vrot.lane.b32.xlu2 %v2173_v37, %s2319_s27 }
 0x27d   : > { %v1515_v44 = vpop.permute.xlu0 %1514  ;;  %v1828_v43 = vld [vmem:[#allocation2 + $0x70] sm:$0xff]  ;;  %v1547_v1 = vpop.permute.xlu1 %1546 }
 0x27e   : > { %1598 = vst.msk [vmem:[#allocation2 + $0x68] sm:$0xff] %vm1584_vm7, %v1515_v44  ;;  %2250 = vmatpush.xpose.msk.msra.mxu0 %vm1852_vm9, %v1828_v43  ;;  %v1844_v4 = vld [vmem:[#allocation2 + $0xf0] sm:$0xff]  ;;  %v1543_v6 = vpop.permute.xlu2 %1542 }
 0x27f   : > { %1614 = vst.msk [vmem:[#allocation2 + $0xe8] sm:$0xff] %vm1584_vm7, %v1547_v1  ;;  %2267 = vmatpush.xpose.msk.msra.mxu1 %vm1852_vm9, %v1844_v4 }
 0x280   : > { %1791 = vst.msk [vmem:[#allocation2 + $0x68] sm:$0xff] %vm1777_vm8, %v1708_v52  ;;  %v2201_v52 = vld [vmem:[%s2365_s21 + $0xf1] sm:$0xff] }
 0x283   : > { %1496 = vrot.lane.b32.xlu0 %v2189_v2, %s2320_s28  ;;  %1528 = vrot.lane.b32.xlu1 %v2205_v5, %s2320_s28 }
 0x284   : > { %1689 = vrot.lane.b32.xlu2 %v2221_v46, %s2321_s29 }
 0x285   : > { %v1740_v51 = vpop.permute.xlu0 %1739  ;;  %v1352_v7 = vpop.permute.xlu1 %1351 }
 0x286   : > { %1807 = vst.msk [vmem:[#allocation2 + $0xe8] sm:$0xff] %vm1777_vm8, %v1740_v51  ;;  %v1348_v9 = vpop.permute.xlu2 %1347 }
 0x287   : > { %1420 = vst.msk [vmem:[#allocation2 + $0xe0] sm:$0xff] %vm1391_vm6, %v1352_v7  ;;  %v1827_v8 = vld [vmem:[#allocation2 + $0x68] sm:$0xff] }
 0x288   : > { %2251 = vmatpush.xpose.msk.msra.mxu0 %vm1852_vm9, %v1827_v8  ;;  %1418 = vst.msk [vmem:[#allocation2 + $0xd0] sm:$0xff] %vm1391_vm6, %v1348_v9 }
 0x28b   : > { %1721 = vrot.lane.b32.xlu0 %v2237_v53, %s2321_s29  ;;  %1333 = vrot.lane.b32.xlu1 %v2172_v58, %s2319_s27 }
 0x28c   : > { %1494 = vrot.lane.b32.xlu2 %v2188_v10, %s2320_s28 }
 0x28d   : > { %v1545_v62 = vpop.permute.xlu0 %1544  ;;  %v1843_v33 = vld [vmem:[#allocation2 + $0xe8] sm:$0xff]  ;;  %v1706_v11 = vpop.permute.xlu1 %1705 }
 0x28e   : > { %1613 = vst.msk [vmem:[#allocation2 + $0xe0] sm:$0xff] %vm1584_vm7, %v1545_v62  ;;  %2268 = vmatpush.xpose.msk.msra.mxu1 %vm1852_vm9, %v1843_v33  ;;  %v1702_v39 = vpop.permute.xlu2 %1701 }
 0x28f   : > { %1790 = vst.msk [vmem:[#allocation2 + $0x60] sm:$0xff] %vm1777_vm8, %v1706_v11 }
 0x290   : > { %1806 = vst.msk [vmem:[#allocation2 + $0xe0] sm:$0xff] %vm1777_vm8, %v1738_v57 }
 0x293   : > { %1526 = vrot.lane.b32.xlu0 %v2204_v12, %s2320_s28  ;;  %1687 = vrot.lane.b32.xlu1 %v2220_v49, %s2321_s29 }
 0x294   : > { %1719 = vrot.lane.b32.xlu2 %v2236_v13, %s2321_s29 }
 0x295   : > { %v1350_v14 = vpop.permute.xlu0 %1349  ;;  %v1511_v15 = vpop.permute.xlu1 %1510 }
 0x296   : > { %1419 = vst.msk [vmem:[#allocation2 + $0xd8] sm:$0xff] %vm1391_vm6, %v1350_v14  ;;  %v1826_v0 = vld [vmem:[#allocation2 + $0x60] sm:$0xff]  ;;  %v1507_v18 = vpop.permute.xlu2 %1506 }
 0x297   : > { %1596 = vst.msk [vmem:[#allocation2 + $0x58] sm:$0xff] %vm1584_vm7, %v1511_v15  ;;  %2252 = vmatpush.xpose.msk.msra.mxu0 %vm1852_vm9, %v1826_v0  ;;  %v1842_v32 = vld [vmem:[#allocation2 + $0xe0] sm:$0xff] }
 0x298   : > { %1612 = vst.msk [vmem:[#allocation2 + $0xd8] sm:$0xff] %vm1584_vm7, %v1543_v6  ;;  %2269 = vmatpush.xpose.msk.msra.mxu1 %vm1852_vm9, %v1842_v32 }
 0x299   : > { %1594 = vst.msk [vmem:[#allocation2 + $0x48] sm:$0xff] %vm1584_vm7, %v1507_v18 }
 0x29b   : > { %1331 = vrot.lane.b32.xlu0 %v2171_v16, %s2319_s27  ;;  %1492 = vrot.lane.b32.xlu1 %v2187_v17, %s2320_s28 }
 0x29c   : > { %1524 = vrot.lane.b32.xlu2 %v2203_v19, %s2320_s28 }
 0x29d   : > { %v1704_v55 = vpop.permute.xlu0 %1703  ;;  %v1736_v20 = vpop.permute.xlu1 %1735 }
 0x29e   : > { %1789 = vst.msk [vmem:[#allocation2 + $0x58] sm:$0xff] %vm1777_vm8, %v1704_v55  ;;  %v1732_v23 = vpop.permute.xlu2 %1731 }
 0x29f   : > { %1805 = vst.msk [vmem:[#allocation2 + $0xd8] sm:$0xff] %vm1777_vm8, %v1736_v20 }
 0x2a3   : > { %1685 = vrot.lane.b32.xlu0 %v2219_v21, %s2321_s29  ;;  %1717 = vrot.lane.b32.xlu1 %v2235_v22, %s2321_s29 }
 0x2a4   : > { %1490 = vrot.lane.b32.xlu2 %v2186_v24, %s2320_s28 }
 0x2a5   : > { %v1509_v25 = vpop.permute.xlu0 %1508  ;;  %v1825_v26 = vld [vmem:[#allocation2 + $0x58] sm:$0xff]  ;;  %v1541_v27 = vpop.permute.xlu1 %1540 }
 0x2a6   : > { %1595 = vst.msk [vmem:[#allocation2 + $0x50] sm:$0xff] %vm1584_vm7, %v1509_v25  ;;  %2253 = vmatpush.xpose.msk.msra.mxu0 %vm1852_vm9, %v1825_v26  ;;  %v1841_v36 = vld [vmem:[#allocation2 + $0xd8] sm:$0xff]  ;;  %v1537_v31 = vpop.permute.xlu2 %1536 }
 0x2a7   : > { %1611 = vst.msk [vmem:[#allocation2 + $0xd0] sm:$0xff] %vm1584_vm7, %v1541_v27  ;;  %2270 = vmatpush.xpose.msk.msra.mxu1 %vm1852_vm9, %v1841_v36  ;;  %v1846_v36 = vld [vmem:[%s3537_s3] sm:$0xff] }
 0x2a8   : > { %1788 = vst.msk [vmem:[#allocation2 + $0x50] sm:$0xff] %vm1777_vm8, %v1702_v39 }
 0x2ab   : > { %1522 = vrot.lane.b32.xlu0 %v2202_v29, %s2320_s28  ;;  %1683 = vrot.lane.b32.xlu1 %v2218_v30, %s2321_s29  ;;  %v2322_v30 = vmov 0  }
 0x2ac   : > { %1715 = vrot.lane.b32.xlu2 %v2234_v38, %s2321_s29  ;;  %2304 = vset.pattern.permute.xlu1 %v2322_v30 }
 0x2ad   : > { %v1734_v42 = vpop.permute.xlu0 %1733  ;;  %v1346_v45 = vpop.permute.xlu1 %1345  ;;  %2305 = vset.pattern.permute.xlu0 %v2322_v30 }
 0x2ae   : > { %1804 = vst.msk [vmem:[#allocation2 + $0xd0] sm:$0xff] %vm1777_vm8, %v1734_v42  ;;  %v1342_v50 = vpop.permute.xlu2 %1341 }
 0x2af   : > { %1417 = vst.msk [vmem:[#allocation2 + $0xc8] sm:$0xff] %vm1391_vm6, %v1346_v45  ;;  %v1824_v60 = vld [vmem:[#allocation2 + $0x50] sm:$0xff] }
 0x2b0   : > { %2254 = vmatpush.xpose.msk.msra.mxu0 %vm1852_vm9, %v1824_v60  ;;  %1415 = vst.msk [vmem:[#allocation2 + $0xb8] sm:$0xff] %vm1391_vm6, %v1342_v50 }
 0x2b3   : > { %1488 = vrot.lane.b32.xlu0 %v2185_v61, %s2320_s28  ;;  %1520 = vrot.lane.b32.xlu1 %v2201_v52, %s2320_s28 }
 0x2b4   : > { %1681 = vrot.lane.b32.xlu2 %v2217_v34, %s2321_s29 }
 0x2b5   : > { %v1539_v3 = vpop.permute.xlu0 %1538  ;;  %v1840_v63 = vld [vmem:[#allocation2 + $0xd0] sm:$0xff]  ;;  %v1700_v48 = vpop.permute.xlu1 %1699 }
 0x2b6   : > { %1610 = vst.msk [vmem:[#allocation2 + $0xc8] sm:$0xff] %vm1584_vm7, %v1539_v3  ;;  %2271 = vmatpush.xpose.msk.msra.mxu1 %vm1852_vm9, %v1840_v63  ;;  %v1696_v41 = vpop.permute.xlu2 %1695  ;;  %v1810_v3 = vld [vmem:[%s3536_s2] sm:$0xff]  ;;  %v1812_v63 = vstv %s1811_s6 }
 0x2b7   : > { %1787 = vst.msk [vmem:[#allocation2 + $0x48] sm:$0xff] %vm1777_vm8, %v1700_v48 }
 0x2b8   : > { %1803 = vst.msk [vmem:[#allocation2 + $0xc8] sm:$0xff] %vm1777_vm8, %v1732_v23 }
 0x2bb   : > { %1713 = vrot.lane.b32.xlu0 %v2233_v54, %s2321_s29  ;;  %1849 = vperm.xlu1 %2304, %v1846_v36  }
 0x2bd   : > { %v1344_v35 = vpop.permute.xlu0 %1343  ;;  %v1505_v47 = vpop.permute.xlu1 %1504 }
 0x2be   : > { %1416 = vst.msk [vmem:[#allocation2 + $0xc0] sm:$0xff] %vm1391_vm6, %v1344_v35  ;;  %v1823_v56 = vld [vmem:[#allocation2 + $0x48] sm:$0xff]  ;;  %v1501_v40 = vpop.permute.xlu2 %1500 }
 0x2bf   : > { %1593 = vst.msk [vmem:[#allocation2 + $0x40] sm:$0xff] %vm1584_vm7, %v1505_v47  ;;  %2255 = vmatpush.xpose.msk.msra.mxu0 %vm1852_vm9, %v1823_v56  ;;  %v1839_v28 = vld [vmem:[#allocation2 + $0xc8] sm:$0xff] }
 0x2c0   : > { %1609 = vst.msk [vmem:[#allocation2 + $0xc0] sm:$0xff] %vm1584_vm7, %v1537_v31  ;;  %2272 = vmatpush.xpose.msk.msra.mxu1 %vm1852_vm9, %v1839_v28 }
 0x2c1   : > { %1591 = vst.msk [vmem:[#allocation2 + $0x30] sm:$0xff] %vm1584_vm7, %v1501_v40 }
 0x2c5   : > { %v1698_v59 = vpop.permute.xlu0 %1697  ;;  %v1730_v57 = vpop.permute.xlu1 %1729 }
 0x2c6   : > { %1786 = vst.msk [vmem:[#allocation2 + $0x40] sm:$0xff] %vm1777_vm8, %v1698_v59  ;;  %v1726_v37 = vpop.permute.xlu2 %1725 }
 0x2c7   : > { %1802 = vst.msk [vmem:[#allocation2 + $0xc0] sm:$0xff] %vm1777_vm8, %v1730_v57 }
 0x2cd   : > { %v1503_v44 = vpop.permute.xlu0 %1502  ;;  %v1822_v43 = vld [vmem:[#allocation2 + $0x40] sm:$0xff]  ;;  %v1535_v1 = vpop.permute.xlu1 %1534 }
 0x2ce   : > { %1592 = vst.msk [vmem:[#allocation2 + $0x38] sm:$0xff] %vm1584_vm7, %v1503_v44  ;;  %2256 = vmatpush.xpose.msk.msra.mxu0 %vm1852_vm9, %v1822_v43  ;;  %v1838_v4 = vld [vmem:[#allocation2 + $0xc0] sm:$0xff]  ;;  %v1531_v2 = vpop.permute.xlu2 %1530 }
 0x2cf   : > { %1608 = vst.msk [vmem:[#allocation2 + $0xb8] sm:$0xff] %vm1584_vm7, %v1535_v1  ;;  %2273 = vmatpush.xpose.msk.msra.mxu1 %vm1852_vm9, %v1838_v4 }
 0x2d0   : > { %1785 = vst.msk [vmem:[#allocation2 + $0x38] sm:$0xff] %vm1777_vm8, %v1696_v41  ;;  %v1813_v41 = vmul.f32 %v1812_v63, %v1810_v3 }
 0x2d5   : > { %v1728_v5 = vpop.permute.xlu0 %1727  ;;  %v1340_v6 = vpop.permute.xlu1 %1339 }
 0x2d6   : > { %1801 = vst.msk [vmem:[#allocation2 + $0xb8] sm:$0xff] %vm1777_vm8, %v1728_v5  ;;  %v1336_v51 = vpop.permute.xlu2 %1335 }
 0x2d7   : > { %1414 = vst.msk [vmem:[#allocation2 + $0xb0] sm:$0xff] %vm1391_vm6, %v1340_v6  ;;  %v1821_v46 = vld [vmem:[#allocation2 + $0x38] sm:$0xff] }
 0x2d8   : > { %2257 = vmatpush.xpose.msk.msra.mxu0 %vm1852_vm9, %v1821_v46  ;;  %1412 = vst.msk [vmem:[#allocation2 + $0xa0] sm:$0xff] %vm1391_vm6, %v1336_v51 }
 0x2dd   : > { %v1533_v7 = vpop.permute.xlu0 %1532  ;;  %v1837_v8 = vld [vmem:[#allocation2 + $0xb8] sm:$0xff]  ;;  %v1694_v53 = vpop.permute.xlu1 %1693 }
 0x2de   : > { %1607 = vst.msk [vmem:[#allocation2 + $0xb0] sm:$0xff] %vm1584_vm7, %v1533_v7  ;;  %2274 = vmatpush.xpose.msk.msra.mxu1 %vm1852_vm9, %v1837_v8  ;;  %v1690_v58 = vpop.permute.xlu2 %1689 }
 0x2df   : > { %1784 = vst.msk [vmem:[#allocation2 + $0x30] sm:$0xff] %vm1777_vm8, %v1694_v53 }
 0x2e0   : > { %1800 = vst.msk [vmem:[#allocation2 + $0xb0] sm:$0xff] %vm1777_vm8, %v1726_v37 }
 0x2e5   : > { %v1338_v9 = vpop.permute.xlu0 %1337  ;;  %v1499_v10 = vpop.permute.xlu1 %1498 }
 0x2e6   : > { %1413 = vst.msk [vmem:[#allocation2 + $0xa8] sm:$0xff] %vm1391_vm6, %v1338_v9  ;;  %v1820_v62 = vld [vmem:[#allocation2 + $0x30] sm:$0xff]  ;;  %v1495_v11 = vpop.permute.xlu2 %1494 }
 0x2e7   : > { %1590 = vst.msk [vmem:[#allocation2 + $0x28] sm:$0xff] %vm1584_vm7, %v1499_v10  ;;  %2258 = vmatpush.xpose.msk.msra.mxu0 %vm1852_vm9, %v1820_v62  ;;  %v1836_v33 = vld [vmem:[#allocation2 + $0xb0] sm:$0xff] }
 0x2e8   : > { %1606 = vst.msk [vmem:[#allocation2 + $0xa8] sm:$0xff] %vm1584_vm7, %v1531_v2  ;;  %2275 = vmatpush.xpose.msk.msra.mxu1 %vm1852_vm9, %v1836_v33 }
 0x2e9   : > { %1588 = vst.msk [vmem:[#allocation2 + $0x18] sm:$0xff] %vm1584_vm7, %v1495_v11 }
 0x2ed   : > { %v1692_v12 = vpop.permute.xlu0 %1691  ;;  %v1724_v49 = vpop.permute.xlu1 %1723 }
 0x2ee   : > { %1783 = vst.msk [vmem:[#allocation2 + $0x28] sm:$0xff] %vm1777_vm8, %v1692_v12  ;;  %v1720_v39 = vpop.permute.xlu2 %1719 }
 0x2ef   : > { %1799 = vst.msk [vmem:[#allocation2 + $0xa8] sm:$0xff] %vm1777_vm8, %v1724_v49 }
 0x2f5   : > { %v1497_v13 = vpop.permute.xlu0 %1496  ;;  %v1819_v14 = vld [vmem:[#allocation2 + $0x28] sm:$0xff]  ;;  %v1529_v15 = vpop.permute.xlu1 %1528 }
 0x2f6   : > { %1589 = vst.msk [vmem:[#allocation2 + $0x20] sm:$0xff] %vm1584_vm7, %v1497_v13  ;;  %2259 = vmatpush.xpose.msk.msra.mxu0 %vm1852_vm9, %v1819_v14  ;;  %v1835_v0 = vld [vmem:[#allocation2 + $0xa8] sm:$0xff]  ;;  %v1525_v32 = vpop.permute.xlu2 %1524 }
 0x2f7   : > { %1605 = vst.msk [vmem:[#allocation2 + $0xa0] sm:$0xff] %vm1584_vm7, %v1529_v15  ;;  %2276 = vmatpush.xpose.msk.msra.mxu1 %vm1852_vm9, %v1835_v0 }
 0x2f8   : > { %1782 = vst.msk [vmem:[#allocation2 + $0x20] sm:$0xff] %vm1777_vm8, %v1690_v58 }
 0x2fd   : > { %v1722_v16 = vpop.permute.xlu0 %1721  ;;  %v1334_v17 = vpop.permute.xlu1 %1333 }
 0x2fe   : > { %1798 = vst.msk [vmem:[#allocation2 + $0xa0] sm:$0xff] %vm1777_vm8, %v1722_v16  ;;  %v1491_v19 = vpop.permute.xlu2 %1490 }
 0x2ff   : > { %1411 = vst.msk [vmem:[#allocation2 + $0x98] sm:$0xff] %vm1391_vm6, %v1334_v17  ;;  %v1818_v18 = vld [vmem:[#allocation2 + $0x20] sm:$0xff] }
 0x300   : > { %2260 = vmatpush.xpose.msk.msra.mxu0 %vm1852_vm9, %v1818_v18  ;;  %1586 = vst.msk [vmem:[#allocation2 + $0x8] sm:$0xff] %vm1584_vm7, %v1491_v19 }
 0x305   : > { %v1527_v55 = vpop.permute.xlu0 %1526  ;;  %v1834_v20 = vld [vmem:[#allocation2 + $0xa0] sm:$0xff]  ;;  %v1688_v21 = vpop.permute.xlu1 %1687 }
 0x306   : > { %1604 = vst.msk [vmem:[#allocation2 + $0x98] sm:$0xff] %vm1584_vm7, %v1527_v55  ;;  %2277 = vmatpush.xpose.msk.msra.mxu1 %vm1852_vm9, %v1834_v20  ;;  %v1716_v29 = vpop.permute.xlu2 %1715 }
 0x307   : > { %1781 = vst.msk [vmem:[#allocation2 + $0x18] sm:$0xff] %vm1777_vm8, %v1688_v21 }
 0x308   : > { %1797 = vst.msk [vmem:[#allocation2 + $0x98] sm:$0xff] %vm1777_vm8, %v1720_v39 }
 0x30d   : > { %v1332_v22 = vpop.permute.xlu0 %1331  ;;  %v1493_v23 = vpop.permute.xlu1 %1492 }
 0x30e   : > { %1410 = vst.msk [vmem:[#allocation2 + $0x90] sm:$0xff] %vm1391_vm6, %v1332_v22  ;;  %v1817_v24 = vld [vmem:[#allocation2 + $0x18] sm:$0xff]  ;;  %v1682_v60 = vpop.permute.xlu2 %1681 }
 0x30f   : > { %1587 = vst.msk [vmem:[#allocation2 + $0x10] sm:$0xff] %vm1584_vm7, %v1493_v23  ;;  %2261 = vmatpush.xpose.msk.msra.mxu0 %vm1852_vm9, %v1817_v24  ;;  %v1833_v25 = vld [vmem:[#allocation2 + $0x98] sm:$0xff] }
 0x310   : > { %1603 = vst.msk [vmem:[#allocation2 + $0x90] sm:$0xff] %vm1584_vm7, %v1525_v32  ;;  %2278 = vmatpush.xpose.msk.msra.mxu1 %vm1852_vm9, %v1833_v25 }
 0x315   : > { %v1686_v26 = vpop.permute.xlu0 %1685  ;;  %v1718_v27 = vpop.permute.xlu1 %1717 }
 0x316   : > { %1780 = vst.msk [vmem:[#allocation2 + $0x10] sm:$0xff] %vm1777_vm8, %v1686_v26 }
 0x317   : > { %1796 = vst.msk [vmem:[#allocation2 + $0x90] sm:$0xff] %vm1777_vm8, %v1718_v27 }
 0x31d   : > { %v1523_v31 = vpop.permute.xlu0 %1522  ;;  %v1816_v38 = vld [vmem:[#allocation2 + $0x10] sm:$0xff]  ;;  %v1684_v42 = vpop.permute.xlu1 %1683 }
 0x31e   : > { %1602 = vst.msk [vmem:[#allocation2 + $0x88] sm:$0xff] %vm1584_vm7, %v1523_v31  ;;  %2262 = vmatpush.xpose.msk.msra.mxu0 %vm1852_vm9, %v1816_v38  ;;  %v1832_v45 = vld [vmem:[#allocation2 + $0x90] sm:$0xff] }
 0x31f   : > { %1779 = vst.msk [vmem:[#allocation2 + $0x8] sm:$0xff] %vm1777_vm8, %v1684_v42  ;;  %2279 = vmatpush.xpose.msk.msra.mxu1 %vm1852_vm9, %v1832_v45 }
 0x320   : > { %1795 = vst.msk [vmem:[#allocation2 + $0x88] sm:$0xff] %vm1777_vm8, %v1716_v29 }
 0x325   : > { %v1489_v61 = vpop.permute.xlu0 %1488  ;;  %v1521_v52 = vpop.permute.xlu1 %1520 }
 0x326   : > { %1585 = vst.msk [vmem:[#allocation2] sm:$0xff] %vm1584_vm7, %v1489_v61  ;;  %v1815_v50 = vld [vmem:[#allocation2 + $0x8] sm:$0xff] }
 0x327   : > { %1601 = vst.msk [vmem:[#allocation2 + $0x80] sm:$0xff] %vm1584_vm7, %v1521_v52  ;;  %2263 = vmatpush.xpose.msk.msra.mxu0 %vm1852_vm9, %v1815_v50  ;;  %v1831_v34 = vld [vmem:[#allocation2 + $0x88] sm:$0xff] }
 0x328   : > { %1778 = vst.msk [vmem:[#allocation2] sm:$0xff] %vm1777_vm8, %v1682_v60  ;;  %2280 = vmatpush.xpose.msk.msra.mxu1 %vm1852_vm9, %v1831_v34 }
 0x32d   : > { %v1714_v48 = vpop.permute.xlu0 %1713  ;;  %v1850_v47 = vpop.permute.xlu1 %1849 }
 0x32e   : > { %1794 = vst.msk [vmem:[#allocation2 + $0x80] sm:$0xff] %vm1777_vm8, %v1714_v48 }
 0x32f   : > { %v1814_v54 = vld [vmem:[#allocation2] sm:$0xff] }
 0x330   : > { %2264 = vmatpush.xpose.msk.msra.mxu0 %vm1852_vm9, %v1814_v54 }
 0x333   : > { %2265 = vmatmul.msk.f32.vlgmr.msra.gmra.mxu0 %vm1852_vm9, %v1813_v41 }
 0x335   : > { %v1830_v35 = vld [vmem:[#allocation2 + $0x80] sm:$0xff] }
 0x336   : > { %2281 = vmatpush.xpose.msk.msra.mxu1 %vm1852_vm9, %v1830_v35 }
 0x339   : > { %2282 = vmatmul.msk.f32.vlgmr.msra.gmra.mxu1 %vm1852_vm9, %v1813_v41 }
 0x3b0   : > { %v1969_v56 = vpop.f32.mrf.mxu0 }
 0x3b1   : > { %v1970_v28 = vadd.f32 %v1969_v56, %v1850_v47 }
 0x3b3   : > { %1992 = vst [vmem:[%s198_s12] sm:$0xff] %v1970_v28 }
 0x3b6   : > { %v1989_v40 = vpop.f32.mrf.mxu1 }
 0x3b7   : > { %v1990_v59 = vadd.f32 %v1989_v40, %v1850_v47 }
 0x3b9   : > { %1993 = vst [vmem:[%s198_s12 + $0x8] sm:$0xff] %v1990_v59 }
 0x3ba PF: > { %s15_s17 = sadd.s32 1, %s2312_s17  }
 0x3bb   : > { %p12_p4 = scmp.ge.s32.totalorder %s15_s17, 4  }
 0x3bd   :  { %14 = sbr.rel (!%p12_p4) target bundleno = 2 (0x2), region = 68 }

</bundles_post_ra>
